<compile_context>
chip_gen: v6e
topology: v6e:2x2x1
jax: 0.10.0
libtpu: 0.0.40
codegen_flags: <defaults>
</compile_context>

<pallas_src>
import math

import numpy as np
import jax
import jax.numpy as jnp
from jax.experimental import pallas as pl
from jax.experimental.pallas import tpu as pltpu


def _cdiv(a, b):
    return -(-a // b)


def _round_up(a, m):
    return _cdiv(a, m) * m


def make_coop_pred_kernel(A, n_head, d_k, d_v):
    DQ = A * n_head * d_k          # fused Q (= K) lane width
    DV = A * n_head * d_v          # fused V / context lane width
    G = A * n_head                 # number of (query-agent, head) score groups
    scale = 1.0 / math.sqrt(float(d_k))

    def kernel(obs_ref, wqkv_ref, qkvb_ref, segsum_ref, segbc_ref, scat_ref,
               xb_ref, oh_ref, wo_ref, lnavg_ref, lng_ref, lnb_ref,
               w1_ref, b1_ref, w2_ref, b2_ref, out_ref, attn_ref):
        f32 = jnp.float32
        obs = obs_ref[...]                                        # (TB, A*obs_dim)
        TB = obs.shape[0]

        # ---- fused block-diagonal Q/K/V projection; the one-hot agent-id part of
        #      the input is a constant per-lane bias, so only raw obs streams in ----
        qkv = jnp.dot(obs, wqkv_ref[...], preferred_element_type=f32) + qkvb_ref[...]
        q = qkv[:, :DQ] * scale                                   # 1/sqrt(d_k)
        k = qkv[:, DQ:2 * DQ]
        v = qkv[:, 2 * DQ:2 * DQ + DV]

        # ---- attention scores on the VPU: shifting K by `delta` agent blocks aligns
        #      key agent (qa+delta)%A with query agent qa on the same lanes; a 0/1
        #      segment-sum matmul reduces each (agent, head) d_k group ----
        segsum = segsum_ref[...]                                  # (DQ, G)
        s = []
        for delta in range(1, A):
            sh = delta * n_head * d_k
            k_sh = jnp.concatenate([k[:, sh:], k[:, :sh]], axis=1)
            s.append(jnp.dot(q * k_sh, segsum, preferred_element_type=f32))   # (TB, G)

        # ---- softmax over the A-1 off-diagonal key agents (self position gets -1e9
        #      in the reference, i.e. exactly 0 probability) ----
        m = s[0]
        for t in s[1:]:
            m = jnp.maximum(m, t)
        e = [jnp.exp(t - m) for t in s]
        denom = e[0]
        for t in e[1:]:
            denom = denom + t
        inv = 1.0 / denom

        # ---- probs scattered straight into the flat PyTorch (head, q, k) layout;
        #      context = VPU weighted sum of lane-shifted V (no 4x4 MXU matmuls) ----
        segbc = segbc_ref[...]                                    # (G, DV)
        attn = jnp.zeros(attn_ref.shape, f32)
        ctx = jnp.zeros((TB, DV), f32)
        for i, delta in enumerate(range(1, A)):
            p = e[i] * inv                                        # (TB, G)
            attn = attn + jnp.dot(p, scat_ref[i * G:(i + 1) * G, :],
                                  preferred_element_type=f32)
            shv = delta * n_head * d_v
            v_sh = jnp.concatenate([v[:, shv:], v[:, :shv]], axis=1)
            ctx = ctx + jnp.dot(p, segbc, preferred_element_type=f32) * v_sh
        attn_ref[...] = attn.astype(attn_ref.dtype)

        # ---- output projection + residual + LayerNorm(eps=1e-6) per agent block ----
        x = jnp.dot(obs, xb_ref[...], preferred_element_type=f32) + oh_ref[...]
        o = jnp.dot(ctx, wo_ref[...], preferred_element_type=f32) + x   # dropout = id
        lnavg = lnavg_ref[...]
        mu = jnp.dot(o, lnavg, preferred_element_type=f32)
        oc = o - mu
        var = jnp.dot(oc * oc, lnavg, preferred_element_type=f32)
        o = oc / jnp.sqrt(var + 1e-6) * lng_ref[...] + lnb_ref[...]

        # ---- position-wise feed forward: w2(relu(w1(x))) ----
        h1 = jnp.maximum(jnp.dot(o, w1_ref[...], preferred_element_type=f32) + b1_ref[...], 0.0)
        y = jnp.dot(h1, w2_ref[...], preferred_element_type=f32) + b2_ref[...]
        out_ref[...] = y.astype(out_ref.dtype)

    return kernel


def _build_constants(params, A, obs_dim, n_head, d_k, d_v, n_actions):
    """Host-side constants: block-diagonal weights, one-hot lane biases, segment
    sum/broadcast/scatter matrices, LayerNorm averaging matrix, tiled affines."""
    d_model = obs_dim + A
    d_inner = params['w1'].shape[0]
    eyeA = jnp.eye(A, dtype=jnp.float32)
    G = A * n_head

    def bd(w):                       # PyTorch (out,in) weight -> per-agent block diag
        return jnp.kron(eyeA, w.T)   # for right-multiplication: x_flat @ bd(w)

    def obs_part(w):                 # obs columns only (one-hot part folded into bias)
        return jnp.kron(eyeA, w[:, :obs_dim].T)

    def id_bias(w):                  # one-hot agent-id contribution as a lane bias
        return w[:, obs_dim:].T.reshape(1, -1)      # (1, A*out): [a*out+o] = w[o, obs_dim+a]

    w_qkv = jnp.concatenate([obs_part(params['wq']), obs_part(params['wk']),
                             obs_part(params['wv'])], axis=1)
    qkv_b = jnp.concatenate([id_bias(params['wq']), id_bias(params['wk']),
                             id_bias(params['wv'])], axis=1)

    seg_sum = jnp.kron(jnp.eye(G, dtype=jnp.float32), jnp.ones((d_k, 1), jnp.float32))
    seg_bc = jnp.kron(jnp.eye(G, dtype=jnp.float32), jnp.ones((1, d_v), jnp.float32))

    scat = np.zeros((A - 1, G, n_head * A * A), np.float32)
    for delta in range(1, A):
        for qa in range(A):
            for h in range(n_head):
                ka = (qa + delta) % A
                scat[delta - 1, qa * n_head + h, h * A * A + qa * A + ka] = 1.0
    scat = jnp.asarray(scat.reshape((A - 1) * G, n_head * A * A))

    x_build = jnp.kron(eyeA, jnp.eye(obs_dim, d_model, dtype=jnp.float32))
    oh = np.zeros((A, d_model), np.float32)
    oh[:, obs_dim:] = np.eye(A, dtype=np.float32)
    oh = jnp.asarray(oh.reshape(1, A * d_model))

    wo = bd(params['wo'])
    ln_avg = jnp.kron(eyeA, jnp.full((d_model, d_model), 1.0 / d_model, jnp.float32))
    ln_g = jnp.tile(params['ln_g'].reshape(1, d_model), (1, A))
    ln_b = jnp.tile(params['ln_b'].reshape(1, d_model), (1, A))
    w1 = bd(params['w1'])
    b1 = jnp.tile(params['b1'].reshape(1, d_inner), (1, A))
    w2 = bd(params['w2'])
    b2 = jnp.tile(params['b2'].reshape(1, n_actions), (1, A))

    return [w_qkv, qkv_b, seg_sum, seg_bc, scat, x_build, oh,
            wo, ln_avg, ln_g, ln_b, w1, b1, w2, b2]


def init_params(key, d_model, n_head, d_k, d_v, d_inner, n_actions):
    ks = jax.random.split(key, 8)
    s = 0.1
    return {
        'wq': jax.random.normal(ks[0], (n_head * d_k, d_model), jnp.float32) * s,
        'wk': jax.random.normal(ks[1], (n_head * d_k, d_model), jnp.float32) * s,
        'wv': jax.random.normal(ks[2], (n_head * d_v, d_model), jnp.float32) * s,
        'wo': jax.random.normal(ks[3], (d_model, n_head * d_v), jnp.float32) * s,
        'ln_g': jnp.ones((1, d_model), jnp.float32),
        'ln_b': jnp.zeros((1, d_model), jnp.float32),
        'w1': jax.random.normal(ks[4], (d_inner, d_model), jnp.float32) * s,
        'b1': jax.random.normal(ks[5], (1, d_inner), jnp.float32) * s,
        'w2': jax.random.normal(ks[6], (n_actions, d_inner), jnp.float32) * s,
        'b2': jax.random.normal(ks[7], (1, n_actions), jnp.float32) * s,
    }


def coop_pred_forward(obs, params, *, n_head, d_k, d_v, n_actions, tile_b=1024):
    """obs: (batch, T, n_agents, obs_dim) — mirrors ep_batch['obs']."""
    batch, T, A, obs_dim = obs.shape
    d_model = obs_dim + A
    d_inner = params['w1'].shape[0]
    B = batch * (T - 1)

    # obs[:, :-1] flattened to a lane-dense 2-D slab (free row-major view)
    obs_flat = obs[:, :-1].astype(jnp.float32).reshape(B, A * obs_dim)

    # ---- tile selection: one big 8-row-aligned tile when B fits (v5e/v6e are
    #      single-TensorCore, extra grid steps are pure overhead); otherwise large
    #      tiles with an even step count so v7x's two cores split evenly ----
    tb = min(_round_up(max(B, 1), 8), _round_up(tile_b, 8))
    nb = _cdiv(B, tb)
    if nb > 1 and nb % 2 == 1:
        nb += 1
        tb = _round_up(_cdiv(B, nb), 8)
        nb = _cdiv(B, tb)
    B_pad = nb * tb
    if B_pad != B:
        obs_flat = jnp.pad(obs_flat, ((0, B_pad - B), (0, 0)))

    consts = _build_constants(params, A, obs_dim, n_head, d_k, d_v, n_actions)
    kernel = make_coop_pred_kernel(A, n_head, d_k, d_v)

    in_specs = [pl.BlockSpec((tb, A * obs_dim), lambda i: (i, 0))]
    in_specs += [pl.BlockSpec(c.shape, lambda i: (0, 0)) for c in consts]
    out_specs = [pl.BlockSpec((tb, A * n_actions), lambda i: (i, 0)),
                 pl.BlockSpec((tb, n_head * A * A), lambda i: (i, 0))]
    out_shape = [jax.ShapeDtypeStruct((B_pad, A * n_actions), jnp.float32),
                 jax.ShapeDtypeStruct((B_pad, n_head * A * A), jnp.float32)]

    DQ, DV, G = A * n_head * d_k, A * n_head * d_v, A * n_head
    macs = B_pad * (A * obs_dim * (2 * DQ + DV)                     # fused QKV
                    + (A - 1) * (DQ * G + G * n_head * A * A + G * DV)
                    + (A * obs_dim) * (A * d_model)                 # residual build
                    + DV * (A * d_model)                            # out projection
                    + 2 * (A * d_model) ** 2                        # LN mean/var
                    + (A * d_model) * (A * d_inner)                 # FFN w1
                    + (A * d_inner) * (A * n_actions))              # FFN w2
    flops = 2 * macs + 8 * B_pad * (DQ + DV)                        # + VPU attention
    const_bytes = 4 * sum(int(c.size) for c in consts)
    bytes_accessed = 4 * B_pad * (A * obs_dim + A * n_actions + n_head * A * A) + const_bytes

    enc_out, attn = pl.pallas_call(
        kernel,
        grid=(nb,),
        in_specs=in_specs,
        out_specs=out_specs,
        out_shape=out_shape,
        compiler_params=pltpu.CompilerParams(
            dimension_semantics=("parallel",),
            vmem_limit_bytes=40 * 1024 * 1024),
        cost_estimate=pl.CostEstimate(flops=flops,
                                      transcendentals=B_pad * (A - 1) * G,
                                      bytes_accessed=bytes_accessed),
    )(obs_flat, *consts)

    # free row-major views back to the PyTorch shapes; drop padded rows
    enc_out = enc_out.reshape(B_pad, A, n_actions)[:B]
    attn = attn.reshape(B_pad, n_head, A, A)[:B]
    return enc_out, attn


def reference_forward(x, mask, p, n_head, d_k, d_v):
    """Pure-JAX reference of the same math (for correctness checking)."""
    B, A, D = x.shape
    x2 = x.reshape(B * A, D)
    q = (x2 @ p['wq'].T).reshape(B, A, n_head, d_k).transpose(0, 2, 1, 3)
    k = (x2 @ p['wk'].T).reshape(B, A, n_head, d_k).transpose(0, 2, 1, 3)
    v = (x2 @ p['wv'].T).reshape(B, A, n_head, d_v).transpose(0, 2, 1, 3)
    s = (q / jnp.sqrt(jnp.float32(d_k))) @ jnp.swapaxes(k, -1, -2)
    s = jnp.where(mask[None, None] == 0, -1e9, s)
    attn = jax.nn.softmax(s, axis=-1)
    ctx = (attn @ v).transpose(0, 2, 1, 3).reshape(B * A, n_head * d_v)
    o = ctx @ p['wo'].T + x2
    mu = o.mean(-1, keepdims=True)
    var = ((o - mu) ** 2).mean(-1, keepdims=True)
    o = (o - mu) / jnp.sqrt(var + 1e-6) * p['ln_g'] + p['ln_b']
    h = jax.nn.relu(o @ p['w1'].T + p['b1'])
    y = h @ p['w2'].T + p['b2']
    return y.reshape(B, A, -1), attn


if __name__ == "__main__":
    key = jax.random.PRNGKey(0)
    # small shapes consistent with the module: args.n_agents=4, args.n_head=2,
    # args.n_actions=6, scheme['obs']['vshape']=12 -> d_model = 12 + 4 = 16
    batch, T, n_agents, obs_dim = 2, 9, 4, 12
    n_head, d_k, d_v, d_inner, n_actions = 2, 32, 32, 32, 6
    d_model = obs_dim + n_agents

    k_obs, k_par = jax.random.split(key)
    obs = jax.random.normal(k_obs, (batch, T, n_agents, obs_dim), jnp.float32)
    params = init_params(k_par, d_model, n_head, d_k, d_v, d_inner, n_actions)

    enc_out, attn = coop_pred_forward(obs, params, n_head=n_head, d_k=d_k, d_v=d_v,
                                      n_actions=n_actions)
    jax.block_until_ready((enc_out, attn))

    # correctness check against pure-JAX reference
    obs_f = obs[:, :-1].reshape(-1, n_agents, obs_dim)
    B = obs_f.shape[0]
    x = jnp.concatenate(
        [obs_f, jnp.broadcast_to(jnp.eye(n_agents, dtype=obs.dtype), (B, n_agents, n_agents))],
        axis=-1)
    mask = 1.0 - jnp.eye(n_agents, dtype=jnp.float32)
    ref_out, ref_attn = reference_forward(x, mask, params, n_head, d_k, d_v)

    assert enc_out.shape == (B, n_agents, n_actions)
    assert attn.shape == (B, n_head, n_agents, n_agents)
    # Tolerance covers TPU MXU default-precision (bfloat16 operand) rounding across
    # the different-but-mathematically-equivalent contraction groupings used by the
    # kernel vs. the reference; structural bugs would show up as O(0.1-1) errors.
    assert jnp.allclose(enc_out, ref_out, atol=5e-3, rtol=5e-3), \
        float(jnp.max(jnp.abs(enc_out - ref_out)))
    assert jnp.allclose(attn, ref_attn, atol=5e-3, rtol=5e-3), \
        float(jnp.max(jnp.abs(attn - ref_attn)))

    print("KERNEL_OK")
</pallas_src>

<mosaic_0001>
module attributes {stable_mosaic.version = 11 : i64} {
  func.func @kernel(%arg0: i32, %arg1: memref<16x48xf32, #tpu.memory_space<vmem>>, %arg2: memref<48x768xf32, #tpu.memory_space<vmem>>, %arg3: memref<1x768xf32, #tpu.memory_space<vmem>>, %arg4: memref<256x8xf32, #tpu.memory_space<vmem>>, %arg5: memref<8x256xf32, #tpu.memory_space<vmem>>, %arg6: memref<24x32xf32, #tpu.memory_space<vmem>>, %arg7: memref<48x64xf32, #tpu.memory_space<vmem>>, %arg8: memref<1x64xf32, #tpu.memory_space<vmem>>, %arg9: memref<256x64xf32, #tpu.memory_space<vmem>>, %arg10: memref<64x64xf32, #tpu.memory_space<vmem>>, %arg11: memref<1x64xf32, #tpu.memory_space<vmem>>, %arg12: memref<1x64xf32, #tpu.memory_space<vmem>>, %arg13: memref<64x128xf32, #tpu.memory_space<vmem>>, %arg14: memref<1x128xf32, #tpu.memory_space<vmem>>, %arg15: memref<128x24xf32, #tpu.memory_space<vmem>>, %arg16: memref<1x24xf32, #tpu.memory_space<vmem>>, %arg17: memref<16x24xf32, #tpu.memory_space<vmem>>, %arg18: memref<16x32xf32, #tpu.memory_space<vmem>>) attributes {dimension_semantics = [#tpu.dimension_semantics<parallel>], iteration_bounds = array<i64: 1>, scalar_prefetch = 0 : i64, scratch_operands = 0 : i64, tpu.core_type = #tpu.core_type<tc>, window_params = [{transform_indices = @transform_0, window_bounds = array<i64: 16, 48>}, {pipeline_mode = #tpu.pipeline_mode<synchronous>, transform_indices = @transform_1, window_bounds = array<i64: 48, 768>}, {pipeline_mode = #tpu.pipeline_mode<synchronous>, transform_indices = @transform_2, window_bounds = array<i64: 1, 768>}, {pipeline_mode = #tpu.pipeline_mode<synchronous>, transform_indices = @transform_3, window_bounds = array<i64: 256, 8>}, {pipeline_mode = #tpu.pipeline_mode<synchronous>, transform_indices = @transform_4, window_bounds = array<i64: 8, 256>}, {pipeline_mode = #tpu.pipeline_mode<synchronous>, transform_indices = @transform_5, window_bounds = array<i64: 24, 32>}, {pipeline_mode = #tpu.pipeline_mode<synchronous>, transform_indices = @transform_6, window_bounds = array<i64: 48, 64>}, {pipeline_mode = #tpu.pipeline_mode<synchronous>, transform_indices = @transform_7, window_bounds = array<i64: 1, 64>}, {pipeline_mode = #tpu.pipeline_mode<synchronous>, transform_indices = @transform_8, window_bounds = array<i64: 256, 64>}, {pipeline_mode = #tpu.pipeline_mode<synchronous>, transform_indices = @transform_9, window_bounds = array<i64: 64, 64>}, {pipeline_mode = #tpu.pipeline_mode<synchronous>, transform_indices = @transform_10, window_bounds = array<i64: 1, 64>}, {pipeline_mode = #tpu.pipeline_mode<synchronous>, transform_indices = @transform_11, window_bounds = array<i64: 1, 64>}, {pipeline_mode = #tpu.pipeline_mode<synchronous>, transform_indices = @transform_12, window_bounds = array<i64: 64, 128>}, {pipeline_mode = #tpu.pipeline_mode<synchronous>, transform_indices = @transform_13, window_bounds = array<i64: 1, 128>}, {pipeline_mode = #tpu.pipeline_mode<synchronous>, transform_indices = @transform_14, window_bounds = array<i64: 128, 24>}, {pipeline_mode = #tpu.pipeline_mode<synchronous>, transform_indices = @transform_15, window_bounds = array<i64: 1, 24>}, {transform_indices = @transform_16, window_bounds = array<i64: 16, 24>}, {transform_indices = @transform_17, window_bounds = array<i64: 16, 32>}]} {
    %c0 = arith.constant 0 : index
    %c0_0 = arith.constant 0 : index
    %0 = vector.load %arg1[%c0, %c0_0] : memref<16x48xf32, #tpu.memory_space<vmem>>, vector<16x48xf32>
    %c0_1 = arith.constant 0 : index
    %c0_2 = arith.constant 0 : index
    %1 = vector.load %arg2[%c0_1, %c0_2] : memref<48x768xf32, #tpu.memory_space<vmem>>, vector<48x768xf32>
    %cst = arith.constant dense<0.000000e+00> : vector<16x768xf32>
    %2 = tpu.matmul %0, %1, %cst {dimension_numbers = #tpu.dot_dimension_numbers<[1], [0], [0], [1], [0, 0, 1, 1], [], []>} : vector<16x48xf32>, vector<48x768xf32>, vector<16x768xf32> -> vector<16x768xf32>
    %c0_3 = arith.constant 0 : index
    %c0_4 = arith.constant 0 : index
    %3 = vector.load %arg3[%c0_3, %c0_4] : memref<1x768xf32, #tpu.memory_space<vmem>>, vector<1x768xf32>
    %4 = vector.broadcast %3 : vector<1x768xf32> to vector<16x768xf32>
    %5 = arith.addf %2, %4 : vector<16x768xf32>
    %6 = vector.extract_strided_slice %5 {offsets = [0, 0], sizes = [16, 256], strides = [1, 1]} : vector<16x768xf32> to vector<16x256xf32>
    %cst_5 = arith.constant 0.176776692 : f32
    %7 = vector.broadcast %cst_5 : f32 to vector<16x256xf32>
    %8 = arith.mulf %6, %7 : vector<16x256xf32>
    %9 = vector.extract_strided_slice %5 {offsets = [0, 256], sizes = [16, 256], strides = [1, 1]} : vector<16x768xf32> to vector<16x256xf32>
    %10 = vector.extract_strided_slice %5 {offsets = [0, 512], sizes = [16, 256], strides = [1, 1]} : vector<16x768xf32> to vector<16x256xf32>
    %c0_6 = arith.constant 0 : index
    %c0_7 = arith.constant 0 : index
    %11 = vector.load %arg4[%c0_6, %c0_7] : memref<256x8xf32, #tpu.memory_space<vmem>>, vector<256x8xf32>
    %12 = vector.extract_strided_slice %9 {offsets = [0, 64], sizes = [16, 192], strides = [1, 1]} : vector<16x256xf32> to vector<16x192xf32>
    %13 = vector.extract_strided_slice %9 {offsets = [0, 0], sizes = [16, 64], strides = [1, 1]} : vector<16x256xf32> to vector<16x64xf32>
    %14 = tpu.concatenate %12, %13 in 1 : vector<16x192xf32>, vector<16x64xf32> -> vector<16x256xf32>
    %15 = arith.mulf %8, %14 : vector<16x256xf32>
    %cst_8 = arith.constant dense<0.000000e+00> : vector<16x8xf32>
    %16 = tpu.matmul %15, %11, %cst_8 {dimension_numbers = #tpu.dot_dimension_numbers<[1], [0], [0], [1], [0, 0, 1, 1], [], []>} : vector<16x256xf32>, vector<256x8xf32>, vector<16x8xf32> -> vector<16x8xf32>
    %17 = vector.extract_strided_slice %9 {offsets = [0, 128], sizes = [16, 128], strides = [1, 1]} : vector<16x256xf32> to vector<16x128xf32>
    %18 = vector.extract_strided_slice %9 {offsets = [0, 0], sizes = [16, 128], strides = [1, 1]} : vector<16x256xf32> to vector<16x128xf32>
    %19 = tpu.concatenate %17, %18 in 1 : vector<16x128xf32>, vector<16x128xf32> -> vector<16x256xf32>
    %20 = arith.mulf %8, %19 : vector<16x256xf32>
    %cst_9 = arith.constant dense<0.000000e+00> : vector<16x8xf32>
    %21 = tpu.matmul %20, %11, %cst_9 {dimension_numbers = #tpu.dot_dimension_numbers<[1], [0], [0], [1], [0, 0, 1, 1], [], []>} : vector<16x256xf32>, vector<256x8xf32>, vector<16x8xf32> -> vector<16x8xf32>
    %22 = vector.extract_strided_slice %9 {offsets = [0, 192], sizes = [16, 64], strides = [1, 1]} : vector<16x256xf32> to vector<16x64xf32>
    %23 = vector.extract_strided_slice %9 {offsets = [0, 0], sizes = [16, 192], strides = [1, 1]} : vector<16x256xf32> to vector<16x192xf32>
    %24 = tpu.concatenate %22, %23 in 1 : vector<16x64xf32>, vector<16x192xf32> -> vector<16x256xf32>
    %25 = arith.mulf %8, %24 : vector<16x256xf32>
    %cst_10 = arith.constant dense<0.000000e+00> : vector<16x8xf32>
    %26 = tpu.matmul %25, %11, %cst_10 {dimension_numbers = #tpu.dot_dimension_numbers<[1], [0], [0], [1], [0, 0, 1, 1], [], []>} : vector<16x256xf32>, vector<256x8xf32>, vector<16x8xf32> -> vector<16x8xf32>
    %27 = arith.maximumf %16, %21 : vector<16x8xf32>
    %28 = arith.maximumf %27, %26 : vector<16x8xf32>
    %29 = arith.subf %16, %28 : vector<16x8xf32>
    %30 = math.exp %29 : vector<16x8xf32>
    %31 = arith.subf %21, %28 : vector<16x8xf32>
    %32 = math.exp %31 : vector<16x8xf32>
    %33 = arith.subf %26, %28 : vector<16x8xf32>
    %34 = math.exp %33 : vector<16x8xf32>
    %35 = arith.addf %30, %32 : vector<16x8xf32>
    %36 = arith.addf %35, %34 : vector<16x8xf32>
    %cst_11 = arith.constant 1.000000e+00 : f32
    %37 = vector.broadcast %cst_11 : f32 to vector<16x8xf32>
    %38 = arith.divf %37, %36 : vector<16x8xf32>
    %c0_12 = arith.constant 0 : index
    %c0_13 = arith.constant 0 : index
    %39 = vector.load %arg5[%c0_12, %c0_13] : memref<8x256xf32, #tpu.memory_space<vmem>>, vector<8x256xf32>
    %cst_14 = arith.constant 0.000000e+00 : f32
    %40 = vector.broadcast %cst_14 : f32 to vector<16x32xf32>
    %cst_15 = arith.constant 0.000000e+00 : f32
    %41 = vector.broadcast %cst_15 : f32 to vector<16x256xf32>
    %42 = arith.mulf %30, %38 : vector<16x8xf32>
    %c0_16 = arith.constant 0 : index
    %c0_17 = arith.constant 0 : index
    %43 = vector.load %arg6[%c0_16, %c0_17] : memref<24x32xf32, #tpu.memory_space<vmem>>, vector<8x32xf32>
    %cst_18 = arith.constant dense<0.000000e+00> : vector<16x32xf32>
    %44 = tpu.matmul %42, %43, %cst_18 {dimension_numbers = #tpu.dot_dimension_numbers<[1], [0], [0], [1], [0, 0, 1, 1], [], []>} : vector<16x8xf32>, vector<8x32xf32>, vector<16x32xf32> -> vector<16x32xf32>
    %45 = arith.addf %40, %44 : vector<16x32xf32>
    %46 = vector.extract_strided_slice %10 {offsets = [0, 64], sizes = [16, 192], strides = [1, 1]} : vector<16x256xf32> to vector<16x192xf32>
    %47 = vector.extract_strided_slice %10 {offsets = [0, 0], sizes = [16, 64], strides = [1, 1]} : vector<16x256xf32> to vector<16x64xf32>
    %48 = tpu.concatenate %46, %47 in 1 : vector<16x192xf32>, vector<16x64xf32> -> vector<16x256xf32>
    %cst_19 = arith.constant dense<0.000000e+00> : vector<16x256xf32>
    %49 = tpu.matmul %42, %39, %cst_19 {dimension_numbers = #tpu.dot_dimension_numbers<[1], [0], [0], [1], [0, 0, 1, 1], [], []>} : vector<16x8xf32>, vector<8x256xf32>, vector<16x256xf32> -> vector<16x256xf32>
    %50 = arith.mulf %49, %48 : vector<16x256xf32>
    %51 = arith.addf %41, %50 : vector<16x256xf32>
    %52 = arith.mulf %32, %38 : vector<16x8xf32>
    %c8 = arith.constant 8 : index
    %c0_20 = arith.constant 0 : index
    %53 = vector.load %arg6[%c8, %c0_20] : memref<24x32xf32, #tpu.memory_space<vmem>>, vector<8x32xf32>
    %cst_21 = arith.constant dense<0.000000e+00> : vector<16x32xf32>
    %54 = tpu.matmul %52, %53, %cst_21 {dimension_numbers = #tpu.dot_dimension_numbers<[1], [0], [0], [1], [0, 0, 1, 1], [], []>} : vector<16x8xf32>, vector<8x32xf32>, vector<16x32xf32> -> vector<16x32xf32>
    %55 = arith.addf %45, %54 : vector<16x32xf32>
    %56 = vector.extract_strided_slice %10 {offsets = [0, 128], sizes = [16, 128], strides = [1, 1]} : vector<16x256xf32> to vector<16x128xf32>
    %57 = vector.extract_strided_slice %10 {offsets = [0, 0], sizes = [16, 128], strides = [1, 1]} : vector<16x256xf32> to vector<16x128xf32>
    %58 = tpu.concatenate %56, %57 in 1 : vector<16x128xf32>, vector<16x128xf32> -> vector<16x256xf32>
    %cst_22 = arith.constant dense<0.000000e+00> : vector<16x256xf32>
    %59 = tpu.matmul %52, %39, %cst_22 {dimension_numbers = #tpu.dot_dimension_numbers<[1], [0], [0], [1], [0, 0, 1, 1], [], []>} : vector<16x8xf32>, vector<8x256xf32>, vector<16x256xf32> -> vector<16x256xf32>
    %60 = arith.mulf %59, %58 : vector<16x256xf32>
    %61 = arith.addf %51, %60 : vector<16x256xf32>
    %62 = arith.mulf %34, %38 : vector<16x8xf32>
    %c16 = arith.constant 16 : index
    %c0_23 = arith.constant 0 : index
    %63 = vector.load %arg6[%c16, %c0_23] : memref<24x32xf32, #tpu.memory_space<vmem>>, vector<8x32xf32>
    %cst_24 = arith.constant dense<0.000000e+00> : vector<16x32xf32>
    %64 = tpu.matmul %62, %63, %cst_24 {dimension_numbers = #tpu.dot_dimension_numbers<[1], [0], [0], [1], [0, 0, 1, 1], [], []>} : vector<16x8xf32>, vector<8x32xf32>, vector<16x32xf32> -> vector<16x32xf32>
    %65 = arith.addf %55, %64 : vector<16x32xf32>
    %66 = vector.extract_strided_slice %10 {offsets = [0, 192], sizes = [16, 64], strides = [1, 1]} : vector<16x256xf32> to vector<16x64xf32>
    %67 = vector.extract_strided_slice %10 {offsets = [0, 0], sizes = [16, 192], strides = [1, 1]} : vector<16x256xf32> to vector<16x192xf32>
    %68 = tpu.concatenate %66, %67 in 1 : vector<16x64xf32>, vector<16x192xf32> -> vector<16x256xf32>
    %cst_25 = arith.constant dense<0.000000e+00> : vector<16x256xf32>
    %69 = tpu.matmul %62, %39, %cst_25 {dimension_numbers = #tpu.dot_dimension_numbers<[1], [0], [0], [1], [0, 0, 1, 1], [], []>} : vector<16x8xf32>, vector<8x256xf32>, vector<16x256xf32> -> vector<16x256xf32>
    %70 = arith.mulf %69, %68 : vector<16x256xf32>
    %71 = arith.addf %61, %70 : vector<16x256xf32>
    %c0_26 = arith.constant 0 : index
    %c0_27 = arith.constant 0 : index
    %72 = vector.load %arg18[%c0_26, %c0_27] : memref<16x32xf32, #tpu.memory_space<vmem>>, vector<16x32xf32>
    tpu.vector_store %arg18[%c0_26, %c0_27], %65 {strides = array<i32>} : memref<16x32xf32, #tpu.memory_space<vmem>>, vector<16x32xf32>,
    %c0_28 = arith.constant 0 : index
    %c0_29 = arith.constant 0 : index
    %73 = vector.load %arg7[%c0_28, %c0_29] : memref<48x64xf32, #tpu.memory_space<vmem>>, vector<48x64xf32>
    %cst_30 = arith.constant dense<0.000000e+00> : vector<16x64xf32>
    %74 = tpu.matmul %0, %73, %cst_30 {dimension_numbers = #tpu.dot_dimension_numbers<[1], [0], [0], [1], [0, 0, 1, 1], [], []>} : vector<16x48xf32>, vector<48x64xf32>, vector<16x64xf32> -> vector<16x64xf32>
    %c0_31 = arith.constant 0 : index
    %c0_32 = arith.constant 0 : index
    %75 = vector.load %arg8[%c0_31, %c0_32] : memref<1x64xf32, #tpu.memory_space<vmem>>, vector<1x64xf32>
    %76 = vector.broadcast %75 : vector<1x64xf32> to vector<16x64xf32>
    %77 = arith.addf %74, %76 : vector<16x64xf32>
    %c0_33 = arith.constant 0 : index
    %c0_34 = arith.constant 0 : index
    %78 = vector.load %arg9[%c0_33, %c0_34] : memref<256x64xf32, #tpu.memory_space<vmem>>, vector<256x64xf32>
    %cst_35 = arith.constant dense<0.000000e+00> : vector<16x64xf32>
    %79 = tpu.matmul %71, %78, %cst_35 {dimension_numbers = #tpu.dot_dimension_numbers<[1], [0], [0], [1], [0, 0, 1, 1], [], []>} : vector<16x256xf32>, vector<256x64xf32>, vector<16x64xf32> -> vector<16x64xf32>
    %80 = arith.addf %79, %77 : vector<16x64xf32>
    %c0_36 = arith.constant 0 : index
    %c0_37 = arith.constant 0 : index
    %81 = vector.load %arg10[%c0_36, %c0_37] : memref<64x64xf32, #tpu.memory_space<vmem>>, vector<64x64xf32>
    %cst_38 = arith.constant dense<0.000000e+00> : vector<16x64xf32>
    %82 = tpu.matmul %80, %81, %cst_38 {dimension_numbers = #tpu.dot_dimension_numbers<[1], [0], [0], [1], [0, 0, 1, 1], [], []>} : vector<16x64xf32>, vector<64x64xf32>, vector<16x64xf32> -> vector<16x64xf32>
    %83 = arith.subf %80, %82 : vector<16x64xf32>
    %84 = arith.mulf %83, %83 : vector<16x64xf32>
    %cst_39 = arith.constant dense<0.000000e+00> : vector<16x64xf32>
    %85 = tpu.matmul %84, %81, %cst_39 {dimension_numbers = #tpu.dot_dimension_numbers<[1], [0], [0], [1], [0, 0, 1, 1], [], []>} : vector<16x64xf32>, vector<64x64xf32>, vector<16x64xf32> -> vector<16x64xf32>
    %cst_40 = arith.constant 9.99999997E-7 : f32
    %86 = vector.broadcast %cst_40 : f32 to vector<16x64xf32>
    %87 = arith.addf %85, %86 : vector<16x64xf32>
    %88 = math.sqrt %87 : vector<16x64xf32>
    %89 = arith.divf %83, %88 : vector<16x64xf32>
    %c0_41 = arith.constant 0 : index
    %c0_42 = arith.constant 0 : index
    %90 = vector.load %arg11[%c0_41, %c0_42] : memref<1x64xf32, #tpu.memory_space<vmem>>, vector<1x64xf32>
    %91 = vector.broadcast %90 : vector<1x64xf32> to vector<16x64xf32>
    %92 = arith.mulf %89, %91 : vector<16x64xf32>
    %c0_43 = arith.constant 0 : index
    %c0_44 = arith.constant 0 : index
    %93 = vector.load %arg12[%c0_43, %c0_44] : memref<1x64xf32, #tpu.memory_space<vmem>>, vector<1x64xf32>
    %94 = vector.broadcast %93 : vector<1x64xf32> to vector<16x64xf32>
    %95 = arith.addf %92, %94 : vector<16x64xf32>
    %c0_45 = arith.constant 0 : index
    %c0_46 = arith.constant 0 : index
    %96 = vector.load %arg13[%c0_45, %c0_46] : memref<64x128xf32, #tpu.memory_space<vmem>>, vector<64x128xf32>
    %cst_47 = arith.constant dense<0.000000e+00> : vector<16x128xf32>
    %97 = tpu.matmul %95, %96, %cst_47 {dimension_numbers = #tpu.dot_dimension_numbers<[1], [0], [0], [1], [0, 0, 1, 1], [], []>} : vector<16x64xf32>, vector<64x128xf32>, vector<16x128xf32> -> vector<16x128xf32>
    %c0_48 = arith.constant 0 : index
    %c0_49 = arith.constant 0 : index
    %98 = vector.load %arg14[%c0_48, %c0_49] : memref<1x128xf32, #tpu.memory_space<vmem>>, vector<1x128xf32>
    %99 = vector.broadcast %98 : vector<1x128xf32> to vector<16x128xf32>
    %100 = arith.addf %97, %99 : vector<16x128xf32>
    %cst_50 = arith.constant 0.000000e+00 : f32
    %101 = vector.broadcast %cst_50 : f32 to vector<16x128xf32>
    %102 = arith.maximumf %100, %101 : vector<16x128xf32>
    %c0_51 = arith.constant 0 : index
    %c0_52 = arith.constant 0 : index
    %103 = vector.load %arg15[%c0_51, %c0_52] : memref<128x24xf32, #tpu.memory_space<vmem>>, vector<128x24xf32>
    %cst_53 = arith.constant dense<0.000000e+00> : vector<16x24xf32>
    %104 = tpu.matmul %102, %103, %cst_53 {dimension_numbers = #tpu.dot_dimension_numbers<[1], [0], [0], [1], [0, 0, 1, 1], [], []>} : vector<16x128xf32>, vector<128x24xf32>, vector<16x24xf32> -> vector<16x24xf32>
    %c0_54 = arith.constant 0 : index
    %c0_55 = arith.constant 0 : index
    %105 = vector.load %arg16[%c0_54, %c0_55] : memref<1x24xf32, #tpu.memory_space<vmem>>, vector<1x24xf32>
    %106 = vector.broadcast %105 : vector<1x24xf32> to vector<16x24xf32>
    %107 = arith.addf %104, %106 : vector<16x24xf32>
    %c0_56 = arith.constant 0 : index
    %c0_57 = arith.constant 0 : index
    %108 = vector.load %arg17[%c0_56, %c0_57] : memref<16x24xf32, #tpu.memory_space<vmem>>, vector<16x24xf32>
    tpu.vector_store %arg17[%c0_56, %c0_57], %107 {strides = array<i32>} : memref<16x24xf32, #tpu.memory_space<vmem>>, vector<16x24xf32>,
    return
  }
  func.func @transform_0(%arg0: i32) -> (i32, i32) {
    %c0_i32 = arith.constant 0 : i32
    %c0_i32_0 = arith.constant 0 : i32
    return %arg0, %c0_i32 : i32, i32
  }
  func.func @transform_1(%arg0: i32) -> (i32, i32) {
    %c0_i32 = arith.constant 0 : i32
    %c0_i32_0 = arith.constant 0 : i32
    %c0_i32_1 = arith.constant 0 : i32
    return %c0_i32, %c0_i32_0 : i32, i32
  }
  func.func @transform_2(%arg0: i32) -> (i32, i32) {
    %c0_i32 = arith.constant 0 : i32
    %c0_i32_0 = arith.constant 0 : i32
    %c0_i32_1 = arith.constant 0 : i32
    return %c0_i32, %c0_i32_0 : i32, i32
  }
  func.func @transform_3(%arg0: i32) -> (i32, i32) {
    %c0_i32 = arith.constant 0 : i32
    %c0_i32_0 = arith.constant 0 : i32
    %c0_i32_1 = arith.constant 0 : i32
    return %c0_i32, %c0_i32_0 : i32, i32
  }
  func.func @transform_4(%arg0: i32) -> (i32, i32) {
    %c0_i32 = arith.constant 0 : i32
    %c0_i32_0 = arith.constant 0 : i32
    %c0_i32_1 = arith.constant 0 : i32
    return %c0_i32, %c0_i32_0 : i32, i32
  }
  func.func @transform_5(%arg0: i32) -> (i32, i32) {
    %c0_i32 = arith.constant 0 : i32
    %c0_i32_0 = arith.constant 0 : i32
    %c0_i32_1 = arith.constant 0 : i32
    return %c0_i32, %c0_i32_0 : i32, i32
  }
  func.func @transform_6(%arg0: i32) -> (i32, i32) {
    %c0_i32 = arith.constant 0 : i32
    %c0_i32_0 = arith.constant 0 : i32
    %c0_i32_1 = arith.constant 0 : i32
    return %c0_i32, %c0_i32_0 : i32, i32
  }
  func.func @transform_7(%arg0: i32) -> (i32, i32) {
    %c0_i32 = arith.constant 0 : i32
    %c0_i32_0 = arith.constant 0 : i32
    %c0_i32_1 = arith.constant 0 : i32
    return %c0_i32, %c0_i32_0 : i32, i32
  }
  func.func @transform_8(%arg0: i32) -> (i32, i32) {
    %c0_i32 = arith.constant 0 : i32
    %c0_i32_0 = arith.constant 0 : i32
    %c0_i32_1 = arith.constant 0 : i32
    return %c0_i32, %c0_i32_0 : i32, i32
  }
  func.func @transform_9(%arg0: i32) -> (i32, i32) {
    %c0_i32 = arith.constant 0 : i32
    %c0_i32_0 = arith.constant 0 : i32
    %c0_i32_1 = arith.constant 0 : i32
    return %c0_i32, %c0_i32_0 : i32, i32
  }
  func.func @transform_10(%arg0: i32) -> (i32, i32) {
    %c0_i32 = arith.constant 0 : i32
    %c0_i32_0 = arith.constant 0 : i32
    %c0_i32_1 = arith.constant 0 : i32
    return %c0_i32, %c0_i32_0 : i32, i32
  }
  func.func @transform_11(%arg0: i32) -> (i32, i32) {
    %c0_i32 = arith.constant 0 : i32
    %c0_i32_0 = arith.constant 0 : i32
    %c0_i32_1 = arith.constant 0 : i32
    return %c0_i32, %c0_i32_0 : i32, i32
  }
  func.func @transform_12(%arg0: i32) -> (i32, i32) {
    %c0_i32 = arith.constant 0 : i32
    %c0_i32_0 = arith.constant 0 : i32
    %c0_i32_1 = arith.constant 0 : i32
    return %c0_i32, %c0_i32_0 : i32, i32
  }
  func.func @transform_13(%arg0: i32) -> (i32, i32) {
    %c0_i32 = arith.constant 0 : i32
    %c0_i32_0 = arith.constant 0 : i32
    %c0_i32_1 = arith.constant 0 : i32
    return %c0_i32, %c0_i32_0 : i32, i32
  }
  func.func @transform_14(%arg0: i32) -> (i32, i32) {
    %c0_i32 = arith.constant 0 : i32
    %c0_i32_0 = arith.constant 0 : i32
    %c0_i32_1 = arith.constant 0 : i32
    return %c0_i32, %c0_i32_0 : i32, i32
  }
  func.func @transform_15(%arg0: i32) -> (i32, i32) {
    %c0_i32 = arith.constant 0 : i32
    %c0_i32_0 = arith.constant 0 : i32
    %c0_i32_1 = arith.constant 0 : i32
    return %c0_i32, %c0_i32_0 : i32, i32
  }
  func.func @transform_16(%arg0: i32) -> (i32, i32) {
    %c0_i32 = arith.constant 0 : i32
    %c0_i32_0 = arith.constant 0 : i32
    return %arg0, %c0_i32 : i32, i32
  }
  func.func @transform_17(%arg0: i32) -> (i32, i32) {
    %c0_i32 = arith.constant 0 : i32
    %c0_i32_0 = arith.constant 0 : i32
    return %arg0, %c0_i32 : i32, i32
  }
}

</mosaic_0001>

<bundles_post_ra>
// kernel: tpu_custom_call.1
= control target key start
LH: loop header
LB: loop body
LE: loop exit
PB: predicated region body
PF: predicated region fallthrough
CT: control target
= control target key end

     0   :  { %s3162_s0 = inlined_call_operand.vmem [shape: f32[16,48], index: 0, kind: input, shape index: {}]   ;;  %s3163_s1 = inlined_call_operand.vmem [shape: f32[48,768], index: 1, kind: input, shape index: {}]   ;;  %s3164_s2 = inlined_call_operand.vmem [shape: f32[1,768], index: 2, kind: input, shape index: {}]   ;;  %s3165_s3 = inlined_call_operand.vmem [shape: f32[256,8], index: 3, kind: input, shape index: {}]   ;;  %s3166_s4 = inlined_call_operand.vmem [shape: f32[8,256], index: 4, kind: input, shape index: {}]   ;;  %s3167_s5 = inlined_call_operand.vmem [shape: f32[24,32], index: 5, kind: input, shape index: {}]   ;;  %s3168_s6 = inlined_call_operand.vmem [shape: f32[48,64], index: 6, kind: input, shape index: {}]   ;;  %s3169_s7 = inlined_call_operand.vmem [shape: f32[1,64], index: 7, kind: input, shape index: {}]   ;;  %s3170_s8 = inlined_call_operand.vmem [shape: f32[256,64], index: 8, kind: input, shape index: {}]   ;;  %s3171_s9 = inlined_call_operand.vmem [shape: f32[64,64], index: 9, kind: input, shape index: {}]   ;;  %s3172_s10 = inlined_call_operand.vmem [shape: f32[1,64], index: 10, kind: input, shape index: {}]   ;;  %s3173_s11 = inlined_call_operand.vmem [shape: f32[1,64], index: 11, kind: input, shape index: {}]   ;;  %s3174_s12 = inlined_call_operand.vmem [shape: f32[64,128], index: 12, kind: input, shape index: {}]   ;;  %s3175_s13 = inlined_call_operand.vmem [shape: f32[1,128], index: 13, kind: input, shape index: {}]   ;;  %s3176_s14 = inlined_call_operand.vmem [shape: f32[128,24], index: 14, kind: input, shape index: {}]   ;;  %s3177_s15 = inlined_call_operand.vmem [shape: f32[1,24], index: 15, kind: input, shape index: {}]   ;;  %s3178_s16 = inlined_call_operand.hbm [shape: f32[16,24], index: 16, kind: output, shape index: {0}]   ;;  %s3179_s17 = inlined_call_operand.hbm [shape: f32[16,32], index: 17, kind: output, shape index: {1}]  }
   0x1   :  { %3182 = sst [smem:[#allocation8_spill]] %s3162_s0 }
   0x2   :  { %3183 = sst [smem:[#allocation9_spill]] %s3163_s1 }
   0x3   :  { %23 = vsyncpa [#allocation3], 0  ;;  %s3184_s26 = sld [smem:[#allocation9_spill]]  ;;  %v2308_v4 = vmov 0.0   ;;  %vm127_vm0 = vcmask 392192   ;;  %v2472_v20 = vld [vmem:[%s3165_s3 + $0xf8] sm:$0xff] }
   0x4   :  { %198 = vmatprep.mubr.f32.mxu0 %v2308_v4  ;;  %s3185_s22 = sld [smem:[#allocation8_spill]]  ;;  %v2480_v22 = vld [vmem:[%s3165_s3 + $0x78] sm:$0xff]  ;;  %1895 = vmatprep.subr.mxu1 %v2472_v20 }
   0x5   :  { %1896 = vmatpush3.msra.mxu1 %v2480_v22 }
   0x9   :  { %v90_v0 = vld [vmem:[%s3184_s26 + $0xf8] sm:$0xff]  ;;  %v89_v1 = vld [vmem:[%s3184_s26 + $0xf0] sm:$0xff]  ;;  %v84_v2 = vld [vmem:[%s3184_s26 + $0xc8] sm:$0xff] }
   0xa   :  { %154 = vmatprep.subr.mxu0 %v90_v0  ;;  %v83_v3 = vld [vmem:[%s3184_s26 + $0xc0] sm:$0xff]  ;;  %v78_v5 = vld [vmem:[%s3184_s26 + $0x98] sm:$0xff]  ;;  %v77_v6 = vld [vmem:[%s3184_s26 + $0x90] sm:$0xff] }
   0xb   :  { %155 = vmatpush1.msra.mxu0 %v89_v1  ;;  %v72_v7 = vld [vmem:[%s3184_s26 + $0x68] sm:$0xff]  ;;  %v71_v8 = vld [vmem:[%s3184_s26 + $0x60] sm:$0xff]  ;;  %v66_v9 = vld [vmem:[%s3184_s26 + $0x38] sm:$0xff] }
   0xc   :  { %156 = vmatprep.subr.mxu0 %v84_v2  ;;  %v65_v10 = vld [vmem:[%s3184_s26 + $0x30] sm:$0xff]  ;;  %v60_v11 = vld [vmem:[%s3184_s26 + $0x8] sm:$0xff]  ;;  %v59_v12 = vld [vmem:[%s3184_s26] sm:$0xff] }
   0xd   :  { %157 = vmatpush1.msra.mxu0 %v83_v3  ;;  %v2444_v13 = vld [vmem:[%s3185_s22] sm:$0xff]  ;;  %v92_v14 = vld [vmem:[%s3184_s26 + $0x108] sm:$0xff]  ;;  %v86_v16 = vld [vmem:[%s3184_s26 + $0xd8] sm:$0xff] }
   0xe   :  { %158 = vmatprep.subr.mxu0 %v78_v5  ;;  %v91_v15 = vld [vmem:[%s3184_s26 + $0x100] sm:$0xff]  ;;  %v85_v17 = vld [vmem:[%s3184_s26 + $0xd0] sm:$0xff]  ;;  %v80_v18 = vld [vmem:[%s3184_s26 + $0xa8] sm:$0xff] }
   0xf   :  { %159 = vmatpush1.msra.mxu0 %v77_v6  ;;  %v2467_v19 = vld [vmem:[%s3185_s22 + $0x8] sm:$0xff]  ;;  %v79_v21 = vld [vmem:[%s3184_s26 + $0xa0] sm:$0xff]  ;;  %v74_v23 = vld [vmem:[%s3184_s26 + $0x78] sm:$0xff] }
  0x10   :  { %160 = vmatprep.subr.mxu0 %v72_v7  ;;  %v73_v24 = vld [vmem:[%s3184_s26 + $0x70] sm:$0xff] }
  0x11   :  { %161 = vmatpush1.msra.mxu0 %v71_v8 }
  0x12   :  { %162 = vmatprep.subr.mxu0 %v66_v9 }
  0x13   :  { %163 = vmatpush1.msra.mxu0 %v65_v10 }
  0x14   :  { %164 = vmatprep.subr.mxu0 %v60_v11 }
  0x15   :  { %165 = vmatpush1.msra.mxu0 %v59_v12 }
  0x16   :  { %1864 = vmatmul.mubr.msk.f32.vlgmr.msra.gmra.mxu0 %vm127_vm0, %v2444_v13  ;;  %231 = vmatprep.subr.mxu0 %v92_v14 }
  0x17   :  { %232 = vmatpush1.msra.mxu0 %v91_v15  ;;  %204 = vmatprep.mubr.f32.mxu0 %v2308_v4 }
  0x18   :  { %233 = vmatprep.subr.mxu0 %v86_v16 }
  0x19   :  { %234 = vmatpush1.msra.mxu0 %v85_v17 }
  0x1a   :  { %235 = vmatprep.subr.mxu0 %v80_v18  ;;  %1865 = vmatmul.mubr.msk.f32.gmra.mxu0 %vm127_vm0, %v2467_v19 }
  0x1b   :  { %24 = vsyncpa [#allocation5], 0  ;;  %236 = vmatpush1.msra.mxu0 %v79_v21  ;;  %v68_v25 = vld [vmem:[%s3184_s26 + $0x48] sm:$0xff]  ;;  %275 = vmatprep.mubr.f32.mxu0 %v2308_v4  ;;  %v2499_v26 = vld [vmem:[%s3165_s3 + $0xf0] sm:$0xff]  ;;  %v97_v8 = vlaneseq  ;;  %vm413_vm1 = vcmask 523264   ;;  %vm718_vm2 = vcmask 64512  }
  0x1c   :  { %237 = vmatprep.subr.mxu0 %v74_v23  ;;  %v67_v27 = vld [vmem:[%s3184_s26 + $0x40] sm:$0xff]  ;;  %v2507_v28 = vld [vmem:[%s3165_s3 + $0x70] sm:$0xff]  ;;  %1897 = vmatprep.subr.mxu1 %v2499_v26  ;;  %v62_v29 = vld [vmem:[%s3184_s26 + $0x18] sm:$0xff]  ;;  %vm1225_vm3 = vcmask 261120   ;;  %s2310_s30 = smov [#allocation4]  }
  0x1d   :  { %238 = vmatpush1.msra.mxu0 %v73_v24  ;;  %v2516_v30 = vld [vmem:[%s3165_s3 + $0xe8] sm:$0xff]  ;;  %1898 = vmatpush3.msra.mxu1 %v2507_v28  ;;  %v61_v31 = vld [vmem:[%s3184_s26 + $0x10] sm:$0xff]  ;;  %v94_v33 = vld [vmem:[%s3184_s26 + $0x118] sm:$0xff]  ;;  %v98_v9 = vshrl.u32 %v97_v8, 7 }
  0x1e   :  { %239 = vmatprep.subr.mxu0 %v68_v25  ;;  %v2525_v32 = vld [vmem:[%s3165_s3 + $0x68] sm:$0xff]  ;;  %1899 = vmatprep.subr.mxu1 %v2516_v30  ;;  %v2534_v34 = vld [vmem:[%s3165_s3 + $0xe0] sm:$0xff]  ;;  %v93_v35 = vld [vmem:[%s3184_s26 + $0x110] sm:$0xff] }
  0x1f   :  { %240 = vmatpush1.msra.mxu0 %v67_v27  ;;  %1900 = vmatpush3.msra.mxu1 %v2525_v32  ;;  %v2543_v36 = vld [vmem:[%s3165_s3 + $0x60] sm:$0xff]  ;;  %v88_v37 = vld [vmem:[%s3184_s26 + $0xe8] sm:$0xff]  ;;  %v82_v39 = vld [vmem:[%s3184_s26 + $0xb8] sm:$0xff]  ;;  %v103_v11 = vsub.s32 1, %v98_v9  ;;  %v99_v14 = vsub.s32 0, %v98_v9  ;;  %v107_v17 = vsub.s32 2, %v98_v9 }
  0x20   :  { %241 = vmatprep.subr.mxu0 %v62_v29  ;;  %1901 = vmatprep.subr.mxu1 %v2534_v34  ;;  %v87_v38 = vld [vmem:[%s3184_s26 + $0xe0] sm:$0xff]  ;;  %v2562_v40 = vld [vmem:[%s3165_s3 + $0xd8] sm:$0xff]  ;;  %v81_v41 = vld [vmem:[%s3184_s26 + $0xb0] sm:$0xff]  ;;  %v111_v23 = vsub.s32 3, %v98_v9 }
  0x21   :  { %242 = vmatpush1.msra.mxu0 %v61_v31  ;;  %1902 = vmatpush3.msra.mxu1 %v2543_v36  ;;  %v2570_v42 = vld [vmem:[%s3165_s3 + $0x58] sm:$0xff]  ;;  %v76_v43 = vld [vmem:[%s3184_s26 + $0x88] sm:$0xff]  ;;  %v75_v44 = vld [vmem:[%s3184_s26 + $0x80] sm:$0xff] }
  0x22   :  { %1866 = vmatmul.mubr.msk.f32.vlgmr.msra.gmra.mxu0 %vm127_vm0, %v2444_v13  ;;  %308 = vmatprep.subr.mxu0 %v94_v33  ;;  %v70_v45 = vld [vmem:[%s3184_s26 + $0x58] sm:$0xff]  ;;  %v2589_v46 = vld [vmem:[%s3165_s3 + $0xd0] sm:$0xff]  ;;  %v64_v49 = vld [vmem:[%s3184_s26 + $0x28] sm:$0xff] }
  0x23   :  { %281 = vmatprep.mubr.f32.mxu0 %v2308_v4  ;;  %309 = vmatpush1.msra.mxu0 %v93_v35  ;;  %v69_v47 = vld [vmem:[%s3184_s26 + $0x50] sm:$0xff]  ;;  %v2606_v50 = vld [vmem:[%s3165_s3 + $0xc8] sm:$0xff]  ;;  %v63_v51 = vld [vmem:[%s3184_s26 + $0x20] sm:$0xff] }
  0x24   :  { %310 = vmatprep.subr.mxu0 %v88_v37  ;;  %1903 = vmatprep.subr.mxu1 %v2562_v40  ;;  %v2597_v48 = vld [vmem:[%s3165_s3 + $0x50] sm:$0xff]  ;;  %v2634_v52 = vld [vmem:[%s3165_s3 + $0x48] sm:$0xff]  ;;  %v2640_v53 = vld [vmem:[%s3165_s3 + $0xc0] sm:$0xff] }
  0x25   :  { %311 = vmatpush1.msra.mxu0 %v87_v38  ;;  %1904 = vmatpush3.msra.mxu1 %v2570_v42  ;;  %v2647_v54 = vld [vmem:[%s3165_s3 + $0x40] sm:$0xff]  ;;  %v2654_v55 = vld [vmem:[%s3165_s3 + $0xb8] sm:$0xff]  ;;  %v2668_v57 = vld [vmem:[%s3165_s3 + $0xb0] sm:$0xff] }
  0x26   :  { %1867 = vmatmul.mubr.msk.f32.gmra.mxu0 %vm127_vm0, %v2467_v19  ;;  %312 = vmatprep.subr.mxu0 %v82_v39  ;;  %v2661_v56 = vld [vmem:[%s3165_s3 + $0x38] sm:$0xff]  ;;  %v2675_v58 = vld [vmem:[%s3165_s3 + $0x30] sm:$0xff]  ;;  %v2682_v59 = vld [vmem:[%s3165_s3 + $0xa8] sm:$0xff] }
  0x27   :  { %313 = vmatpush1.msra.mxu0 %v81_v41  ;;  %352 = vmatprep.mubr.f32.mxu0 %v2308_v4  ;;  %v2689_v60 = vld [vmem:[%s3165_s3 + $0x28] sm:$0xff]  ;;  %v2696_v61 = vld [vmem:[%s3165_s3 + $0xa0] sm:$0xff]  ;;  %v2708_v63 = vld [vmem:[%s3165_s3 + $0x98] sm:$0xff] }
  0x28   :  { %314 = vmatprep.subr.mxu0 %v76_v43  ;;  %1905 = vmatprep.subr.mxu1 %v2589_v46  ;;  %v2703_v62 = vld [vmem:[%s3165_s3 + $0x20] sm:$0xff]  ;;  %v2717_v0 = vld [vmem:[%s3165_s3 + $0x18] sm:$0xff]  ;;  %v2724_v1 = vld [vmem:[%s3165_s3 + $0x90] sm:$0xff] }
  0x29   :  { %315 = vmatpush1.msra.mxu0 %v75_v44  ;;  %1906 = vmatpush3.msra.mxu1 %v2597_v48  ;;  %v2731_v2 = vld [vmem:[%s3165_s3 + $0x10] sm:$0xff]  ;;  %v2738_v3 = vld [vmem:[%s3165_s3 + $0x88] sm:$0xff]  ;;  %v2752_v6 = vld [vmem:[%s3165_s3 + $0x80] sm:$0xff] }
  0x2a   :  { %316 = vmatprep.subr.mxu0 %v70_v45  ;;  %1907 = vmatprep.subr.mxu1 %v2606_v50  ;;  %v2745_v5 = vld [vmem:[%s3165_s3 + $0x8] sm:$0xff]  ;;  %v2759_v7 = vld [vmem:[%s3165_s3] sm:$0xff] }
  0x2b   :  { %317 = vmatpush1.msra.mxu0 %v69_v47  ;;  %1908 = vmatpush3.msra.mxu1 %v2634_v52  ;;  %v95_v12 = vld [vmem:[%s3164_s2] sm:$0x3f]  ;;  %s2309_s2 = smov 64  }
  0x2c   :  { %318 = vmatprep.subr.mxu0 %v64_v49  ;;  %1909 = vmatprep.subr.mxu1 %v2640_v53  ;;  %v104_v16 = vrot.slane %v95_v12, %v103_v11  ;;  %v100_v21 = vrot.slane %v95_v12, %v99_v14  ;;  %v108_v25 = vrot.slane %v95_v12, %v107_v17 }
  0x2d   :  { %319 = vmatpush1.msra.mxu0 %v63_v51  ;;  %1910 = vmatpush3.msra.mxu1 %v2647_v54 }
  0x2e   :  { %1933 = vmatprep.subr.mxu0 %v2472_v20  ;;  %1868 = vmatmul.mubr.msk.f32.vlgmr.msra.gmra.mxu0 %vm127_vm0, %v2444_v13 }
  0x2f   :  { %1934 = vmatpush3.msra.mxu0 %v2480_v22  ;;  %358 = vmatprep.mubr.f32.mxu0 %v2308_v4 }
  0x30   :  { %1935 = vmatprep.subr.mxu0 %v2499_v26  ;;  %1911 = vmatprep.subr.mxu1 %v2654_v55 }
  0x31   :  { %1936 = vmatpush3.msra.mxu0 %v2507_v28  ;;  %1912 = vmatpush3.msra.mxu1 %v2661_v56 }
  0x32   :  { %1937 = vmatprep.subr.mxu0 %v2516_v30  ;;  %1869 = vmatmul.mubr.msk.f32.gmra.mxu0 %vm127_vm0, %v2467_v19 }
  0x33   :  { %1938 = vmatpush3.msra.mxu0 %v2525_v32  ;;  %1913 = vmatprep.subr.mxu1 %v2668_v57 }
  0x34   :  { %1939 = vmatprep.subr.mxu0 %v2534_v34  ;;  %1914 = vmatpush3.msra.mxu1 %v2675_v58 }
  0x35   :  { %1940 = vmatpush3.msra.mxu0 %v2543_v36  ;;  %1915 = vmatprep.subr.mxu1 %v2682_v59 }
  0x36   :  { %1941 = vmatprep.subr.mxu0 %v2562_v40  ;;  %1916 = vmatpush3.msra.mxu1 %v2689_v60 }
  0x37   :  { %1942 = vmatpush3.msra.mxu0 %v2570_v42  ;;  %1917 = vmatprep.subr.mxu1 %v2696_v61 }
  0x38   :  { %1943 = vmatprep.subr.mxu0 %v2589_v46  ;;  %1918 = vmatpush3.msra.mxu1 %v2703_v62 }
  0x39   :  { %1944 = vmatpush3.msra.mxu0 %v2597_v48  ;;  %1919 = vmatprep.subr.mxu1 %v2708_v63 }
  0x3a   :  { %1945 = vmatprep.subr.mxu0 %v2606_v50  ;;  %1920 = vmatpush3.msra.mxu1 %v2717_v0 }
  0x3b   :  { %1946 = vmatpush3.msra.mxu0 %v2634_v52  ;;  %1921 = vmatprep.subr.mxu1 %v2724_v1 }
  0x3c   :  { %1947 = vmatprep.subr.mxu0 %v2640_v53  ;;  %1922 = vmatpush3.msra.mxu1 %v2731_v2 }
  0x3d   :  { %1948 = vmatpush3.msra.mxu0 %v2647_v54  ;;  %1923 = vmatprep.subr.mxu1 %v2738_v3 }
  0x3e   :  { %1949 = vmatprep.subr.mxu0 %v2654_v55  ;;  %1924 = vmatpush3.msra.mxu1 %v2745_v5 }
  0x3f   :  { %1950 = vmatpush3.msra.mxu0 %v2661_v56  ;;  %1925 = vmatprep.subr.mxu1 %v2752_v6 }
  0x40   :  { %1951 = vmatprep.subr.mxu0 %v2668_v57  ;;  %1926 = vmatpush3.msra.mxu1 %v2759_v7 }
  0x41   :  { %1952 = vmatpush3.msra.mxu0 %v2675_v58  ;;  %1971 = vmatprep.subr.mxu1 %v2472_v20  ;;  %v112_v20 = vrot.slane %v95_v12, %v111_v23 }
  0x42   :  { %1953 = vmatprep.subr.mxu0 %v2682_v59 }
  0x43   :  { %1954 = vmatpush3.msra.mxu0 %v2689_v60 }
  0x44   :  { %1955 = vmatprep.subr.mxu0 %v2696_v61 }
  0x45   :  { %1956 = vmatpush3.msra.mxu0 %v2703_v62 }
  0x46   :  { %1957 = vmatprep.subr.mxu0 %v2708_v63 }
  0x47   :  { %1958 = vmatpush3.msra.mxu0 %v2717_v0 }
  0x48   :  { %1959 = vmatprep.subr.mxu0 %v2724_v1 }
  0x49   :  { %1960 = vmatpush3.msra.mxu0 %v2731_v2 }
  0x4a   :  { %1961 = vmatprep.subr.mxu0 %v2738_v3 }
  0x4b   :  { %1962 = vmatpush3.msra.mxu0 %v2745_v5 }
  0x4c   :  { %1963 = vmatprep.subr.mxu0 %v2752_v6 }
  0x4d   :  { %1964 = vmatpush3.msra.mxu0 %v2759_v7 }
  0xd6   :  { %v200_v10 = vpop.f32.mrf.mxu0 }
  0xd7   :  { %v201_v29 = vadd.f32 %v200_v10, %v100_v21 }
  0xd8   :  { %v202_v15 = vpop.f32.mrf.mxu0 }
  0xd9   :  { %v203_v24 = vadd.f32 %v202_v15, %v104_v16  ;;  %v2768_v39 = vmul.f32 0.17677669, %v201_v29 }
  0xda   :  { %v206_v18 = vpop.f32.mrf.mxu0 }
  0xdb   :  { %v366_v33 = vmul.f32 0.17677669, %v203_v24  ;;  %v207_v41 = vadd.f32 %v206_v18, %v100_v21  ;;  %v119_v18 = vsub.s32 5, %v98_v9 }
  0xdc   :  { %v208_v27 = vpop.f32.mrf.mxu0 }
  0xdd   :  { %v209_v35 = vadd.f32 %v208_v27, %v104_v16  ;;  %v2774_v10 = vmul.f32 0.17677669, %v207_v41  ;;  %v115_v16 = vsub.s32 4, %v98_v9  ;;  %v120_v23 = vrot.slane %v95_v12, %v119_v18 }
  0xdf   :  { %v2771_v47 = vmul.f32 0.17677669, %v209_v35  ;;  %v116_v21 = vrot.slane %v95_v12, %v115_v16 }
  0xe2   :  { %v277_v31 = vpop.f32.mrf.mxu0 }
  0xe3   :  { %v278_v37 = vadd.f32 %v277_v31, %v108_v25 }
  0xe4   :  { %v279_v38 = vpop.f32.mrf.mxu0 }
  0xe5   :  { %v504_v43 = vmul.f32 %v366_v33, %v278_v37  ;;  %v280_v44 = vadd.f32 %v279_v38, %v112_v20  ;;  %405 = vrot.lane.b32.xlu0 %v278_v37, %s2309_s2 }
  0xe6   :  { %v283_v45 = vpop.f32.mrf.mxu0 }
  0xe7   :  { %v503_v49 = vmul.f32 %v2768_v39, %v280_v44  ;;  %v284_v51 = vadd.f32 %v283_v45, %v108_v25  ;;  %571 = vmatprep.mubr.f32.mxu0 %v504_v43 }
  0xe8   :  { %v285_v8 = vpop.f32.mrf.mxu0 }
  0xe9   :  { %v506_v11 = vmul.f32 %v2771_v47, %v284_v51  ;;  %v286_v14 = vadd.f32 %v285_v8, %v112_v20  ;;  %409 = vrot.lane.b32.xlu1 %v284_v51, %s2309_s2  ;;  %407 = vrot.lane.b32.xlu0 %v280_v44, %s2309_s2 }
  0xea   :  { %572 = vmatmul.mubr.f32.vlgmr.msra.gmra.mxu0 %v503_v49 }
  0xeb   :  { %v505_v15 = vmul.f32 %v2774_v10, %v286_v14  ;;  %576 = vmatprep.mubr.f32.mxu0 %v506_v11 }
  0xed   :  { %411 = vrot.lane.b32.xlu1 %v286_v14, %s2309_s2 }
  0xee   :  { %577 = vmatmul.mubr.f32.gmra.mxu0 %v505_v15  ;;  %v354_v17 = vpop.f32.mrf.mxu0 }
  0xef   :  { %789 = vmatprep.mubr.f32.mxu0 %v2308_v4  ;;  %v2782_v25 = vadd.f32 %v354_v17, %v116_v21 }
  0xf0   :  { %v356_v24 = vpop.f32.mrf.mxu0 }
  0xf1   :  { %v2784_v27 = vadd.f32 %v356_v24, %v120_v23  ;;  %700 = vrot.lane.b32.xlu0 %v2782_v25, %s2309_s2 }
  0xf2   :  { %v360_v29 = vpop.f32.mrf.mxu0 }
  0xf3   :  { %v2786_v20 = vadd.f32 %v360_v29, %v116_v21  ;;  %702 = vrot.lane.b32.xlu1 %v2784_v27, %s2309_s2 }
  0xf4   :  { %v362_v31 = vpop.f32.mrf.mxu0 }
  0xf5   :  { %v2792_v35 = vadd.f32 %v362_v31, %v120_v23  ;;  %704 = vrot.lane.b32.xlu0 %v2786_v20, %s2309_s2 }
  0xf7   :  { %706 = vrot.lane.b32.xlu1 %v2792_v35, %s2309_s2 }
 0x157   :  { %v406_v9 = vpop.permute.xlu0 %405 }
 0x15b   :  { %v410_v12 = vpop.permute.xlu1 %409  ;;  %v408_v37 = vpop.permute.xlu0 %407 }
 0x15c   :  { %v414_v38 = vsel %vm413_vm1, %v406_v9, %v408_v37  ;;  %v422_v41 = vsel %vm413_vm1, %v408_v37, %v406_v9 }
 0x15d   :  { %v424_v43 = vmul.f32 %v414_v38, %v2768_v39  ;;  %v425_v44 = vmul.f32 %v422_v41, %v366_v33  ;;  %v583_v14 = vmul.f32 %v414_v38, %v366_v33 }
 0x15f   :  { %v412_v45 = vpop.permute.xlu1 %411  ;;  %492 = vmatprep.mubr.f32.mxu1 %v425_v44 }
 0x160   :  { %v415_v49 = vsel %vm413_vm1, %v410_v12, %v412_v45  ;;  %v423_v51 = vsel %vm413_vm1, %v412_v45, %v410_v12  ;;  %493 = vmatmul.mubr.f32.vlgmr.msra.gmra.mxu1 %v424_v43 }
 0x161   :  { %v426_v8 = vmul.f32 %v415_v49, %v2774_v10  ;;  %v427_v11 = vmul.f32 %v423_v51, %v2771_v47  ;;  %1972 = vmatpush3.msra.mxu1 %v2480_v22  ;;  %v582_v22 = vmul.f32 %v422_v41, %v2768_v39 }
 0x162   :  { %1973 = vmatprep.subr.mxu1 %v2499_v26  ;;  %v585_v26 = vmul.f32 %v415_v49, %v2771_v47 }
 0x163   :  { %1974 = vmatpush3.msra.mxu1 %v2507_v28  ;;  %497 = vmatprep.mubr.f32.mxu1 %v427_v11  ;;  %v584_v28 = vmul.f32 %v423_v51, %v2774_v10 }
 0x164   :  { %1975 = vmatprep.subr.mxu1 %v2516_v30  ;;  %498 = vmatmul.mubr.f32.gmra.mxu1 %v426_v8  ;;  %v2842_v30 = vld [vmem:[%s3166_s4 + $0x8] sm:$0xff]  ;;  %v695_v8 = vld [vmem:[%s3167_s5] sm:$0xff] }
 0x165   :  { %1976 = vmatpush3.msra.mxu1 %v2525_v32  ;;  %650 = vmatprep.mubr.f32.mxu1 %v583_v14  ;;  %v2847_v32 = vld [vmem:[%s3166_s4] sm:$0xff] }
 0x166   :  { %1977 = vmatprep.subr.mxu1 %v2534_v34  ;;  %v2852_v34 = vld [vmem:[%s3167_s5 + $0x8] sm:$0xff]  ;;  %755 = vmatprep.subr.mxu0 %v2842_v30 }
 0x167   :  { %1978 = vmatpush3.msra.mxu1 %v2543_v36  ;;  %756 = vmatpush1.msra.mxu0 %v2847_v32  ;;  %v1056_v36 = vld [vmem:[%s3167_s5 + $0x10] sm:$0xff]  ;;  %s1849_s5 = sshll.u32 %s2310_s30, 4  ;;  %s1850_s5 = int_to_ptr.vmem [resolvable:$true] %s1849_s5 }
 0x168   :  { %1979 = vmatprep.subr.mxu1 %v2562_v40  ;;  %2112 = vmatprep.subr.mxu0 %v2852_v34  ;;  %s2264_s18 = scalar_lea.vmem %s1850_s5, 256  ;;  %p2269_p1 = scmp.lt.s32.totalorder %s1850_s5, %s1850_s5 }
 0x169   :  { %1980 = vmatpush3.msra.mxu1 %v2570_v42  ;;  %p2265_p0 = scmp.ne.s32.totalorder %s1850_s5, %s2264_s18  ;;  %p2270_p2 = scmp.lt.s32.totalorder %s2264_s18, %s2264_s18 }
 0x16a   :  { %1981 = vmatprep.subr.mxu1 %v2589_v46 }
 0x16b   :  { %1982 = vmatpush3.msra.mxu1 %v2597_v48  ;;  %p2271_p3 = por %p2270_p2, %p2269_p1 }
 0x16c   :  { %1983 = vmatprep.subr.mxu1 %v2606_v50 }
 0x16d   :  { %1984 = vmatpush3.msra.mxu1 %v2634_v52  ;;  %p2272_p4 = pnand %p2271_p3, %p2265_p0 }
 0x16e   :  { %1985 = vmatprep.subr.mxu1 %v2640_v53 }
 0x16f   :  { %1986 = vmatpush3.msra.mxu1 %v2647_v54 }
 0x170   :  { %1987 = vmatprep.subr.mxu1 %v2654_v55 }
 0x171   :  { %1988 = vmatpush3.msra.mxu1 %v2661_v56 }
 0x172   :  { %1989 = vmatprep.subr.mxu1 %v2668_v57 }
 0x173   :  { %1990 = vmatpush3.msra.mxu1 %v2675_v58 }
 0x174   :  { %1991 = vmatprep.subr.mxu1 %v2682_v59 }
 0x175   :  { %1992 = vmatpush3.msra.mxu1 %v2689_v60 }
 0x176   :  { %1993 = vmatprep.subr.mxu1 %v2696_v61 }
 0x177   :  { %1994 = vmatpush3.msra.mxu1 %v2703_v62 }
 0x178   :  { %1995 = vmatprep.subr.mxu1 %v2708_v63 }
 0x179   :  { %1996 = vmatpush3.msra.mxu1 %v2717_v0 }
 0x17a   :  { %1997 = vmatprep.subr.mxu1 %v2724_v1 }
 0x17b   :  { %1998 = vmatpush3.msra.mxu1 %v2731_v2 }
 0x17c   :  { %1999 = vmatprep.subr.mxu1 %v2738_v3 }
 0x17d   :  { %2000 = vmatpush3.msra.mxu1 %v2745_v5 }
 0x17e   :  { %2001 = vmatprep.subr.mxu1 %v2752_v6 }
 0x17f   :  { %2002 = vmatpush3.msra.mxu1 %v2759_v7 }
 0x180   :  { %651 = vmatmul.mubr.f32.vlgmr.msra.gmra.mxu1 %v582_v22  ;;  %2122 = vmatprep.subr.mxu1 %v1056_v36 }
 0x181   :  { %655 = vmatprep.mubr.f32.mxu1 %v585_v26  ;;  %2123 = vmatpush3.msra.mxu1 %v1056_v36  ;;  %v1329_v36 = vld [vmem:[%s3170_s8 + $0x68] sm:$0xff] }
 0x184   :  { %656 = vmatmul.mubr.f32.gmra.mxu1 %v584_v28 }
 0x1aa   :  { %v1965_v42 = vpop.f32.mrf.mxu0 }
 0x1ac   :  { %v1966_v48 = vpop.f32.mrf.mxu0 }
 0x1ad   :  { %v1967_v56 = vadd.f32 %v1966_v48, %v1965_v42  ;;  %v1328_v42 = vld [vmem:[%s3170_s8 + $0x60] sm:$0xff]  ;;  %v1327_v48 = vld [vmem:[%s3170_s8 + $0x58] sm:$0xff] }
 0x1ae   :  { %v1968_v52 = vpop.f32.mrf.mxu0 }
 0x1b0   :  { %v1969_v57 = vpop.f32.mrf.mxu0 }
 0x1b1   :  { %v1970_v62 = vadd.f32 %v1969_v57, %v1968_v52  ;;  %v1326_v52 = vld [vmem:[%s3170_s8 + $0x50] sm:$0xff]  ;;  %v1339_v57 = vld [vmem:[%s3170_s8 + $0xb8] sm:$0xff] }
 0x220   :  { %v1927_v40 = vpop.f32.mrf.mxu1 }
 0x222   :  { %v1928_v46 = vpop.f32.mrf.mxu1 }
 0x223   :  { %v1929_v54 = vadd.f32 %v1928_v46, %v1927_v40  ;;  %v1344_v40 = vld [vmem:[%s3170_s8 + $0xe0] sm:$0xff]  ;;  %v1343_v46 = vld [vmem:[%s3170_s8 + $0xd8] sm:$0xff] }
 0x224   :  { %v1930_v50 = vpop.f32.mrf.mxu1 }
 0x225   :  { %v661_v60 = vmax.f32 %v1929_v54, %v1967_v56 }
 0x226   :  { %v1931_v53 = vpop.f32.mrf.mxu1 }
 0x227   :  { %v1932_v58 = vadd.f32 %v1931_v53, %v1930_v50  ;;  %v1342_v50 = vld [vmem:[%s3170_s8 + $0xd0] sm:$0xff]  ;;  %v1341_v53 = vld [vmem:[%s3170_s8 + $0xc8] sm:$0xff] }
 0x229   :  { %v662_v1 = vmax.f32 %v1932_v58, %v1970_v62 }
 0x240   :  { %v2003_v55 = vpop.f32.mrf.mxu1 }
 0x242   :  { %v2004_v59 = vpop.f32.mrf.mxu1 }
 0x243   :  { %v2005_v61 = vadd.f32 %v2004_v59, %v2003_v55  ;;  %v1340_v55 = vld [vmem:[%s3170_s8 + $0xc0] sm:$0xff]  ;;  %v1338_v59 = vld [vmem:[%s3170_s8 + $0xb0] sm:$0xff] }
 0x244   :  { %v2006_v63 = vpop.f32.mrf.mxu1 }
 0x245   :  { %v663_v0 = vmax.f32 %v661_v60, %v2005_v61  ;;  %v1322_v60 = vld [vmem:[%s3170_s8 + $0x30] sm:$0xff] }
 0x246   :  { %v2007_v2 = vpop.f32.mrf.mxu1 }
 0x247   :  { %v665_v3 = vsub.f32 %v1929_v54, %v663_v0  ;;  %v671_v5 = vsub.f32 %v1967_v56, %v663_v0  ;;  %v677_v6 = vsub.f32 %v2005_v61, %v663_v0  ;;  %v2008_v7 = vadd.f32 %v2007_v2, %v2006_v63  ;;  %v1325_v54 = vld [vmem:[%s3170_s8 + $0x48] sm:$0xff]  ;;  %v1324_v56 = vld [vmem:[%s3170_s8 + $0x40] sm:$0xff] }
 0x248   :  { %v1233_v61 = vld [vmem:[%s3168_s6 + $0x28] sm:$0xff]  ;;  %v1232_v0 = vld [vmem:[%s3168_s6 + $0x20] sm:$0xff] }
 0x249   :  { %v667_v33 = vmul.f32 1.442695, %v665_v3  ;;  %v673_v39 = vmul.f32 1.442695, %v671_v5  ;;  %v664_v47 = vmax.f32 %v662_v1, %v2008_v7  ;;  %v679_v10 = vmul.f32 1.442695, %v677_v6  ;;  %2127 = vmatprep.subr.mxu1 %v1233_v61 }
 0x24a   :  { %v1321_v63 = vld [vmem:[%s3170_s8 + $0x28] sm:$0xff]  ;;  %v1336_v1 = vld [vmem:[%s3170_s8 + $0xa0] sm:$0xff]  ;;  %v1231_v3 = vld [vmem:[%s3168_s6 + $0x18] sm:$0xff] }
 0x24b   :  { %2240 = vpow2.f32 %v667_v33  ;;  %v666_v15 = vsub.f32 %v1932_v58, %v664_v47  ;;  %v672_v16 = vsub.f32 %v1970_v62, %v664_v47  ;;  %v678_v17 = vsub.f32 %v2008_v7, %v664_v47  ;;  %v1323_v58 = vld [vmem:[%s3170_s8 + $0x38] sm:$0xff]  ;;  %v1337_v62 = vld [vmem:[%s3170_s8 + $0xa8] sm:$0xff]  ;;  %v1320_v2 = vld [vmem:[%s3170_s8 + $0x20] sm:$0xff] }
 0x24c   :  { %2242 = vpow2.f32 %v673_v39  ;;  %v1335_v5 = vld [vmem:[%s3170_s8 + $0x98] sm:$0xff]  ;;  %v1230_v7 = vld [vmem:[%s3168_s6 + $0x10] sm:$0xff]  ;;  %v1229_v47 = vld [vmem:[%s3168_s6 + $0x8] sm:$0xff] }
 0x24d   :  { %v669_v18 = vmul.f32 1.442695, %v666_v15  ;;  %v675_v21 = vmul.f32 1.442695, %v672_v16  ;;  %2244 = vpow2.f32 %v679_v10  ;;  %v681_v23 = vmul.f32 1.442695, %v678_v17 }
 0x24e   :  { %v1319_v6 = vld [vmem:[%s3170_s8 + $0x18] sm:$0xff]  ;;  %v1334_v33 = vld [vmem:[%s3170_s8 + $0x90] sm:$0xff]  ;;  %v1333_v10 = vld [vmem:[%s3170_s8 + $0x88] sm:$0xff] }
 0x24f   :  { %2246 = vpow2.f32 %v669_v18  ;;  %v1318_v39 = vld [vmem:[%s3170_s8 + $0x10] sm:$0xff]  ;;  %v1317_v15 = vld [vmem:[%s3170_s8 + $0x8] sm:$0xff]  ;;  %v1228_v16 = vld [vmem:[%s3168_s6] sm:$0xff] }
 0x250   :  { %2248 = vpow2.f32 %v675_v21  ;;  %v1332_v17 = vld [vmem:[%s3170_s8 + $0x80] sm:$0xff]  ;;  %v3006_v21 = vld [vmem:[%s3171_s9 + $0x38] sm:$0xff] }
 0x251   :  { %2250 = vpow2.f32 %v681_v23  ;;  %v1316_v18 = vld [vmem:[%s3170_s8] sm:$0xff]  ;;  %v3011_v23 = vld [vmem:[%s3171_s9 + $0x30] sm:$0xff] }
 0x258   :  { %v2241_v24 = vpop.eup %2240 }
 0x259   :  { %v2243_v29 = vpop.eup %2242 }
 0x25a   :  { %v683_v31 = vadd.f32 %v2243_v29, %v2241_v24  ;;  %v2245_v9 = vpop.eup %2244 }
 0x25c   :  { %v2247_v12 = vpop.eup %2246  ;;  %v685_v37 = vadd.f32 %v2245_v9, %v683_v31 }
 0x25d   :  { %v2249_v38 = vpop.eup %2248 }
 0x25e   :  { %2252 = vrcp.f32 %v685_v37  ;;  %v684_v41 = vadd.f32 %v2249_v38, %v2247_v12  ;;  %v2251_v43 = vpop.eup %2250 }
 0x260   :  { %v686_v44 = vadd.f32 %v2251_v43, %v684_v41 }
 0x262   :  { %2254 = vrcp.f32 %v686_v44 }
 0x26b   :  { %v2253_v45 = vpop.eup %2252 }
 0x26c   :  { %v693_v49 = vmul.f32 %v2253_v45, %v2241_v24  ;;  %v1054_v51 = vmul.f32 %v2253_v45, %v2245_v9  ;;  %v810_v26 = vmul.f32 %v2253_v45, %v2243_v29  ;;  %v3018_v24 = vld [vmem:[%s3171_s9 + $0x28] sm:$0xff] }
 0x26e   :  { %1870 = vmatmul.mubr.msk.f32.vlgmr.msra.gmra.mxu0 %vm718_vm2, %v693_v49  ;;  %2124 = vmatprep.mubr.msk.f32.mxu1 %vm718_vm2, %v1054_v51 }
 0x26f   :  { %v2255_v11 = vpop.eup %2254  ;;  %2113 = vmatpush3.msra.mxu0 %v2852_v34  ;;  %795 = vmatprep.mubr.f32.mxu0 %v2308_v4  ;;  %v1345_v34 = vld [vmem:[%s3170_s8 + $0xe8] sm:$0xff] }
 0x270   :  { %v694_v14 = vmul.f32 %v2255_v11, %v2247_v12  ;;  %v1055_v22 = vmul.f32 %v2255_v11, %v2251_v43  ;;  %2117 = vmatprep.subr.mxu0 %v695_v8  ;;  %v811_v28 = vmul.f32 %v2255_v11, %v2249_v38 }
 0x272   :  { %1871 = vmatmul.mubr.msk.f32.gmra.mxu0 %vm718_vm2, %v694_v14  ;;  %2125 = vmatmul.mubr.msk.f32.vlgmr.msra.gmra.mxu1 %vm718_vm2, %v1055_v22 }
 0x273   :  { %2114 = vmatprep.mubr.msk.f32.mxu0 %vm718_vm2, %v810_v26  ;;  %2139 = vmatprep.mubr.msk.f32.mxu1 %vm127_vm0, %v2444_v13  ;;  %v1347_v13 = vld [vmem:[%s3170_s8 + $0xf8] sm:$0xff] }
 0x274   :  { %2128 = vmatpush3.msra.mxu1 %v1233_v61 }
 0x275   :  { %2129 = vmatprep.subr.mxu1 %v1232_v0 }
 0x276   :  { %2115 = vmatmul.mubr.msk.f32.vlgmr.msra.gmra.mxu0 %vm718_vm2, %v811_v28  ;;  %2130 = vmatpush3.msra.mxu1 %v1232_v0 }
 0x277   :  { %2118 = vmatpush3.msra.mxu0 %v695_v8  ;;  %2119 = vmatprep.mubr.msk.f32.mxu0 %vm718_vm2, %v693_v49 }
 0x278   :  { %999 = vmatprep.subr.mxu0 %v2842_v30  ;;  %2131 = vmatprep.subr.mxu1 %v1231_v3 }
 0x279   :  { %2132 = vmatpush3.msra.mxu1 %v1231_v3 }
 0x27a   :  { %2120 = vmatmul.mubr.msk.f32.vlgmr.msra.gmra.mxu0 %vm718_vm2, %v694_v14  ;;  %2133 = vmatprep.subr.mxu1 %v1230_v7 }
 0x27b   :  { %1000 = vmatpush1.msra.mxu0 %v2847_v32  ;;  %1033 = vmatprep.mubr.f32.mxu0 %v2308_v4 }
 0x27c   :  { %1170 = vmatprep.subr.mxu0 %v2842_v30  ;;  %v1331_v30 = vld [vmem:[%s3170_s8 + $0x78] sm:$0xff]  ;;  %2134 = vmatpush3.msra.mxu1 %v1230_v7  ;;  %v1425_v7 = vld [vmem:[%s3171_s9 + $0x10] sm:$0xff] }
 0x27d   :  { %2135 = vmatprep.subr.mxu1 %v1229_v47 }
 0x27e   :  { %1876 = vmatmul.mubr.msk.f32.vlgmr.msra.gmra.mxu0 %vm718_vm2, %v810_v26  ;;  %2136 = vmatpush3.msra.mxu1 %v1229_v47  ;;  %v703_v26 = vpop.permute.xlu1 %702 }
 0x27f   :  { %1171 = vmatpush1.msra.mxu0 %v2847_v32  ;;  %1039 = vmatprep.mubr.f32.mxu0 %v2308_v4  ;;  %v1346_v32 = vld [vmem:[%s3170_s8 + $0xf0] sm:$0xff] }
 0x280   :  { %2026 = vmatprep.subr.mxu0 %v1347_v13  ;;  %2137 = vmatprep.subr.mxu1 %v1228_v16 }
 0x281   :  { %2138 = vmatpush3.msra.mxu1 %v1228_v16 }
 0x282   :  { %1877 = vmatmul.mubr.msk.f32.gmra.mxu0 %vm718_vm2, %v811_v28  ;;  %2140 = vmatmul.mubr.msk.f32.vlgmr.msra.gmra.mxu1 %vm127_vm0, %v2467_v19  ;;  %v701_v28 = vpop.permute.xlu0 %700 }
 0x283   :  { %1204 = vmatprep.mubr.f32.mxu0 %v2308_v4  ;;  %2142 = vmatprep.subr.mxu1 %v3006_v21 }
 0x284   :  { %2143 = vmatpush3.msra.mxu1 %v3006_v21 }
 0x285   :  { %2144 = vmatprep.subr.mxu1 %v3011_v23 }
 0x286   :  { %1880 = vmatmul.mubr.msk.f32.vlgmr.msra.gmra.mxu0 %vm718_vm2, %v1054_v51  ;;  %2145 = vmatpush3.msra.mxu1 %v3011_v23 }
 0x287   :  { %1210 = vmatprep.mubr.f32.mxu0 %v2308_v4  ;;  %2027 = vmatpush3.msra.mxu0 %v1331_v30  ;;  %v1330_v4 = vld [vmem:[%s3170_s8 + $0x70] sm:$0xff] }
 0x288   :  { %2028 = vmatprep.subr.mxu0 %v1346_v32  ;;  %2146 = vmatprep.subr.mxu1 %v3018_v24  ;;  %v716_v32 = vsel %vm413_vm1, %v703_v26, %v701_v28 }
 0x289   :  { %2029 = vmatpush3.msra.mxu0 %v1330_v4  ;;  %2147 = vmatpush3.msra.mxu1 %v3018_v24 }
 0x28a   :  { %1881 = vmatmul.mubr.msk.f32.gmra.mxu0 %vm718_vm2, %v1055_v22  ;;  %2030 = vmatprep.subr.mxu0 %v1345_v34 }
 0x28b   :  { %2031 = vmatpush3.msra.mxu0 %v1329_v36  ;;  %v707_v36 = vpop.permute.xlu1 %706 }
 0x28c   :  { %2032 = vmatprep.subr.mxu0 %v1344_v40  ;;  %v705_v40 = vpop.permute.xlu0 %704 }
 0x28d   :  { %2033 = vmatpush3.msra.mxu0 %v1328_v42  ;;  %v708_v42 = vsel %vm413_vm1, %v701_v28, %v703_v26  ;;  %v1633_v26 = vld [vmem:[%s3174_s12] sm:$0xff]  ;;  %v1746_v28 = vld [vmem:[%s3176_s14 + $0x78] sm:$0xff] }
 0x28e   :  { %2034 = vmatprep.subr.mxu0 %v1343_v46 }
 0x28f   :  { %2035 = vmatpush3.msra.mxu0 %v1327_v48 }
 0x290   :  { %2036 = vmatprep.subr.mxu0 %v1342_v50 }
 0x291   :  { %2037 = vmatpush3.msra.mxu0 %v1326_v52 }
 0x292   :  { %2038 = vmatprep.subr.mxu0 %v1341_v53 }
 0x293   :  { %2039 = vmatpush3.msra.mxu0 %v1325_v54 }
 0x294   :  { %2040 = vmatprep.subr.mxu0 %v1340_v55 }
 0x295   :  { %2041 = vmatpush3.msra.mxu0 %v1324_v56  ;;  %v717_v56 = vsel %vm413_vm1, %v707_v36, %v705_v40 }
 0x296   :  { %2042 = vmatprep.subr.mxu0 %v1339_v57 }
 0x297   :  { %2043 = vmatpush3.msra.mxu0 %v1323_v58 }
 0x298   :  { %2044 = vmatprep.subr.mxu0 %v1338_v59 }
 0x299   :  { %2045 = vmatpush3.msra.mxu0 %v1322_v60 }
 0x29a   :  { %2046 = vmatprep.subr.mxu0 %v1337_v62 }
 0x29b   :  { %2047 = vmatpush3.msra.mxu0 %v1321_v63 }
 0x29c   :  { %2048 = vmatprep.subr.mxu0 %v1336_v1 }
 0x29d   :  { %2049 = vmatpush3.msra.mxu0 %v1320_v2 }
 0x29e   :  { %2050 = vmatprep.subr.mxu0 %v1335_v5 }
 0x29f   :  { %2051 = vmatpush3.msra.mxu0 %v1319_v6  ;;  %v1426_v6 = vld [vmem:[%s3171_s9 + $0x18] sm:$0xff] }
 0x2a0   :  { %2052 = vmatprep.subr.mxu0 %v1334_v33  ;;  %v1424_v33 = vld [vmem:[%s3171_s9 + $0x8] sm:$0xff] }
 0x2a1   :  { %2053 = vmatpush3.msra.mxu0 %v1318_v39  ;;  %v1423_v39 = vld [vmem:[%s3171_s9] sm:$0xff] }
 0x2a2   :  { %2054 = vmatprep.subr.mxu0 %v1333_v10  ;;  %v1882_v10 = vld [vmem:[%s3169_s7] ss:$0 sm:$0xff] }
 0x2a3   :  { %2055 = vmatpush3.msra.mxu0 %v1317_v15 }
 0x2a4   :  { %2056 = vmatprep.subr.mxu0 %v1332_v17 }
 0x2a5   :  { %2057 = vmatpush3.msra.mxu0 %v1316_v18 }
 0x32e   :  { %v791_v19 = vpop.f32.mrf.mxu0 }
 0x32f   :  { %v802_v48 = vmul.f32 %v791_v19, %v708_v42 }
 0x330   :  { %v793_v29 = vpop.f32.mrf.mxu0 }
 0x331   :  { %v803_v46 = vmul.f32 %v793_v29, %v716_v32 }
 0x332   :  { %v797_v31 = vpop.f32.mrf.mxu0  ;;  %v2126_v38 = vpop.f32.mrf.mxu1 }
 0x334   :  { %v799_v9 = vpop.f32.mrf.mxu0  ;;  %v1129_v51 = vpop.f32.mrf.mxu1 }
 0x335   :  { %v805_v59 = vmul.f32 %v799_v9, %v717_v56 }
 0x336   :  { %v2116_v12 = vpop.f32.mrf.mxu0 }
 0x338   :  { %v885_v37 = vpop.f32.mrf.mxu0 }
 0x33a   :  { %v2121_v41 = vpop.f32.mrf.mxu0 }
 0x33b   :  { %v966_v43 = vadd.f32 %v2121_v41, %v2116_v12 }
 0x33c   :  { %v960_v44 = vpop.f32.mrf.mxu0 }
 0x33d   :  { %v1139_v45 = vadd.f32 %v2126_v38, %v966_v43  ;;  %v961_v49 = vadd.f32 %v960_v44, %v885_v37 }
 0x33e   :  { %v1035_v8 = vpop.f32.mrf.mxu0 }
 0x33f   :  { %1227 = vst.msk [vmem:[#allocation4 + $0x8] sm:$0xff] %vm1225_vm3, %v1139_v45  ;;  %v1138_v11 = vadd.f32 %v1129_v51, %v961_v49  ;;  %v1046_v4 = vmul.f32 %v1035_v8, %v2784_v27  ;;  %v709_v27 = vsel %vm413_vm1, %v705_v40, %v707_v36  ;;  %v1640_v45 = vld [vmem:[%s3174_s12 + $0x38] sm:$0xff]  ;;  %v1639_v49 = vld [vmem:[%s3174_s12 + $0x30] sm:$0xff]  ;;  %v1638_v51 = vld [vmem:[%s3174_s12 + $0x28] sm:$0xff] }
 0x340   :  { %v1037_v14 = vpop.f32.mrf.mxu0  ;;  %v804_v61 = vmul.f32 %v797_v31, %v709_v27  ;;  %2180 = vmatprep.subr.mxu0 %v1640_v45  ;;  %v1637_v8 = vld [vmem:[%s3174_s12 + $0x20] sm:$0xff]  ;;  %v1740_v36 = vld [vmem:[%s3176_s14 + $0x48] sm:$0xff] }
 0x341   :  { %1226 = vst.msk [vmem:[#allocation4] sm:$0xff] %vm1225_vm3, %v1138_v11  ;;  %v1047_v30 = vmul.f32 %v1037_v14, %v2782_v25  ;;  %v1050_v25 = vadd.f32 %v1046_v4, %v802_v48  ;;  %v1636_v11 = vld [vmem:[%s3174_s12 + $0x18] sm:$0xff]  ;;  %v1635_v14 = vld [vmem:[%s3174_s12 + $0x10] sm:$0xff]  ;;  %v1739_v40 = vld [vmem:[%s3176_s14 + $0x40] sm:$0xff] }
 0x342   :  { %v1041_v22 = vpop.f32.mrf.mxu0  ;;  %v2141_v47 = vpop.f32.mrf.mxu1  ;;  %v1742_v4 = vld [vmem:[%s3176_s14 + $0x58] sm:$0xff]  ;;  %v1736_v48 = vld [vmem:[%s3176_s14 + $0x28] sm:$0xff] }
 0x343   :  { %v1051_v53 = vadd.f32 %v1047_v30, %v803_v46  ;;  %v1048_v57 = vmul.f32 %v1041_v22, %v2792_v35  ;;  %v1427_v35 = vld [vmem:[%s3171_s9 + $0x20] sm:$0xff]  ;;  %v1313_v12 = vadd.f32 %v2141_v47, %v1882_v10  ;;  %v1634_v22 = vld [vmem:[%s3174_s12 + $0x8] sm:$0xff]  ;;  %v1737_v46 = vld [vmem:[%s3176_s14 + $0x30] sm:$0xff] }
 0x344   :  { %v1043_v13 = vpop.f32.mrf.mxu0  ;;  %2148 = vmatprep.subr.mxu1 %v1427_v35  ;;  %v1307_v15 = vpop.f32.mrf.mxu1  ;;  %v1744_v30 = vld [vmem:[%s3176_s14 + $0x68] sm:$0xff]  ;;  %v1733_v47 = vld [vmem:[%s3176_s14 + $0x10] sm:$0xff] }
 0x345   :  { %v1049_v54 = vmul.f32 %v1043_v13, %v2786_v20  ;;  %v1052_v3 = vadd.f32 %v1048_v57, %v804_v61  ;;  %2149 = vmatpush3.msra.mxu1 %v1427_v35  ;;  %v1308_v17 = vadd.f32 %v1882_v10, %v1307_v15  ;;  %v1745_v13 = vld [vmem:[%s3176_s14 + $0x70] sm:$0xff]  ;;  %v1732_v10 = vld [vmem:[%s3176_s14 + $0x8] sm:$0xff]  ;;  %v1731_v15 = vld [vmem:[%s3176_s14] sm:$0xff] }
 0x346   :  { %v1206_v34 = vpop.f32.mrf.mxu0  ;;  %2150 = vmatprep.subr.mxu1 %v1426_v6 }
 0x347   :  { %v1217_v50 = vmul.f32 %v1206_v34, %v716_v32  ;;  %v1053_v1 = vadd.f32 %v1049_v54, %v805_v59  ;;  %2151 = vmatpush3.msra.mxu1 %v1426_v6  ;;  %v1743_v32 = vld [vmem:[%s3176_s14 + $0x60] sm:$0xff]  ;;  %v1741_v34 = vld [vmem:[%s3176_s14 + $0x50] sm:$0xff] }
 0x348   :  { %v1208_v52 = vpop.f32.mrf.mxu0  ;;  %2152 = vmatprep.subr.mxu1 %v1425_v7 }
 0x349   :  { %v1218_v55 = vmul.f32 %v1208_v52, %v708_v42  ;;  %v1221_v62 = vadd.f32 %v1217_v50, %v1050_v25  ;;  %2153 = vmatpush3.msra.mxu1 %v1425_v7  ;;  %v1738_v42 = vld [vmem:[%s3176_s14 + $0x38] sm:$0xff]  ;;  %v1735_v50 = vld [vmem:[%s3176_s14 + $0x20] sm:$0xff] }
 0x34a   :  { %v1212_v58 = vpop.f32.mrf.mxu0  ;;  %2154 = vmatprep.subr.mxu1 %v1424_v33 }
 0x34b   :  { %v1222_v60 = vadd.f32 %v1218_v55, %v1051_v53  ;;  %v1219_v63 = vmul.f32 %v1212_v58, %v717_v56  ;;  %2155 = vmatpush3.msra.mxu1 %v1424_v33 }
 0x34c   :  { %v1214_v0 = vpop.f32.mrf.mxu0  ;;  %2156 = vmatprep.subr.mxu1 %v1423_v39 }
 0x34d   :  { %v1220_v2 = vmul.f32 %v1214_v0, %v709_v27  ;;  %1412 = vmatprep.mubr.f32.mxu0 %v1222_v60  ;;  %v1223_v5 = vadd.f32 %v1219_v63, %v1052_v3  ;;  %2157 = vmatpush3.msra.mxu1 %v1423_v39 }
 0x34e   :  { %1413 = vmatmul.mubr.f32.vlgmr.msra.gmra.mxu0 %v1221_v62  ;;  %2161 = vmatprep.subr.mxu1 %v3006_v21 }
 0x34f   :  { %v1224_v20 = vadd.f32 %v1220_v2, %v1053_v1  ;;  %2181 = vmatpush3.msra.mxu0 %v1640_v45  ;;  %v1889_v2 = vld [vmem:[%s3172_s10] ss:$0 sm:$0xff] }
 0x350   :  { %2182 = vmatprep.subr.mxu0 %v1639_v49 }
 0x351   :  { %1417 = vmatprep.mubr.f32.mxu0 %v1224_v20  ;;  %2183 = vmatpush3.msra.mxu0 %v1639_v49 }
 0x352   :  { %1418 = vmatmul.mubr.f32.gmra.mxu0 %v1223_v5  ;;  %2184 = vmatprep.subr.mxu0 %v1638_v51 }
 0x353   :  { %2185 = vmatpush3.msra.mxu0 %v1638_v51 }
 0x354   :  { %2186 = vmatprep.subr.mxu0 %v1637_v8 }
 0x355   :  { %2187 = vmatpush3.msra.mxu0 %v1637_v8 }
 0x356   :  { %2188 = vmatprep.subr.mxu0 %v1636_v11 }
 0x357   :  { %2189 = vmatpush3.msra.mxu0 %v1636_v11 }
 0x358   :  { %2190 = vmatprep.subr.mxu0 %v1635_v14 }
 0x359   :  { %2191 = vmatpush3.msra.mxu0 %v1635_v14 }
 0x35a   :  { %2192 = vmatprep.subr.mxu0 %v1634_v22 }
 0x35b   :  { %2193 = vmatpush3.msra.mxu0 %v1634_v22 }
 0x35c   :  { %2194 = vmatprep.subr.mxu0 %v1633_v26 }
 0x35d   :  { %2195 = vmatpush3.msra.mxu0 %v1633_v26 }
 0x40e   :  { %v2058_v16 = vpop.f32.mrf.mxu0 }
 0x410   :  { %v2059_v18 = vpop.f32.mrf.mxu0 }
 0x411   :  { %v2060_v19 = vadd.f32 %v2059_v18, %v2058_v16  ;;  %v1891_v16 = vld [vmem:[%s3175_s13] ss:$0 sm:$0xff] }
 0x412   :  { %v2061_v29 = vpop.f32.mrf.mxu0 }
 0x413   :  { %v1415_v31 = vadd.f32 %v2060_v19, %v1308_v17 }
 0x414   :  { %v2062_v9 = vpop.f32.mrf.mxu0 }
 0x415   :  { %v2063_v37 = vadd.f32 %v2062_v9, %v2061_v29  ;;  %2158 = vmatprep.mubr.msk.f32.mxu1 %vm413_vm1, %v1415_v31 }
 0x417   :  { %v1420_v38 = vadd.f32 %v2063_v37, %v1313_v12 }
 0x419   :  { %2159 = vmatmul.mubr.msk.f32.vlgmr.msra.gmra.mxu1 %vm413_vm1, %v1420_v38 }
 0x41a   :  { %2162 = vmatpush3.msra.mxu1 %v3006_v21 }
 0x41b   :  { %2163 = vmatprep.subr.mxu1 %v3011_v23 }
 0x41c   :  { %2164 = vmatpush3.msra.mxu1 %v3011_v23 }
 0x41d   :  { %2165 = vmatprep.subr.mxu1 %v3018_v24 }
 0x41e   :  { %2166 = vmatpush3.msra.mxu1 %v3018_v24 }
 0x41f   :  { %2167 = vmatprep.subr.mxu1 %v1427_v35 }
 0x420   :  { %2168 = vmatpush3.msra.mxu1 %v1427_v35 }
 0x421   :  { %2169 = vmatprep.subr.mxu1 %v1426_v6 }
 0x422   :  { %2170 = vmatpush3.msra.mxu1 %v1426_v6  ;;  %v1890_v6 = vld [vmem:[%s3173_s11] ss:$0 sm:$0xff] }
 0x423   :  { %2171 = vmatprep.subr.mxu1 %v1425_v7 }
 0x424   :  { %2172 = vmatpush3.msra.mxu1 %v1425_v7 }
 0x425   :  { %2173 = vmatprep.subr.mxu1 %v1424_v33 }
 0x426   :  { %2174 = vmatpush3.msra.mxu1 %v1424_v33 }
 0x427   :  { %2175 = vmatprep.subr.mxu1 %v1423_v39 }
 0x428   :  { %2176 = vmatpush3.msra.mxu1 %v1423_v39  ;;  %v1734_v39 = vld [vmem:[%s3176_s14 + $0x18] sm:$0xff] }
 0x429   :  { %2199 = vmatprep.subr.mxu1 %v1746_v28 }
 0x4d9   :  { %v2160_v41 = vpop.f32.mrf.mxu1 }
 0x4da   :  { %v3058_v21 = vsub.f32 %v1420_v38, %v2160_v41 }
 0x4db   :  { %v1503_v43 = vpop.f32.mrf.mxu1 }
 0x4dc   :  { %v3060_v44 = vsub.f32 %v1415_v31, %v1503_v43  ;;  %v1515_v24 = vmul.f32 %v3058_v21, %v3058_v21 }
 0x4de   :  { %v1514_v23 = vmul.f32 %v3060_v44, %v3060_v44 }
 0x4e0   :  { %2177 = vmatprep.mubr.msk.f32.mxu1 %vm413_vm1, %v1514_v23 }
 0x4e1   :  { %2178 = vmatmul.mubr.msk.f32.vlgmr.msra.gmra.mxu1 %vm413_vm1, %v1515_v24 }
 0x4e2   :  { %2200 = vmatpush3.msra.mxu1 %v1746_v28 }
 0x4e3   :  { %2201 = vmatprep.subr.mxu1 %v1745_v13 }
 0x4e4   :  { %2202 = vmatpush3.msra.mxu1 %v1745_v13 }
 0x4e5   :  { %2203 = vmatprep.subr.mxu1 %v1744_v30 }
 0x4e6   :  { %2204 = vmatpush3.msra.mxu1 %v1744_v30 }
 0x4e7   :  { %2205 = vmatprep.subr.mxu1 %v1743_v32 }
 0x4e8   :  { %2206 = vmatpush3.msra.mxu1 %v1743_v32 }
 0x4e9   :  { %2207 = vmatprep.subr.mxu1 %v1742_v4 }
 0x4ea   :  { %2208 = vmatpush3.msra.mxu1 %v1742_v4 }
 0x4eb   :  { %2209 = vmatprep.subr.mxu1 %v1741_v34 }
 0x4ec   :  { %2210 = vmatpush3.msra.mxu1 %v1741_v34 }
 0x4ed   :  { %2211 = vmatprep.subr.mxu1 %v1740_v36 }
 0x4ee   :  { %2212 = vmatpush3.msra.mxu1 %v1740_v36 }
 0x4ef   :  { %2213 = vmatprep.subr.mxu1 %v1739_v40 }
 0x4f0   :  { %2214 = vmatpush3.msra.mxu1 %v1739_v40 }
 0x4f1   :  { %2215 = vmatprep.subr.mxu1 %v1738_v42 }
 0x4f2   :  { %2216 = vmatpush3.msra.mxu1 %v1738_v42 }
 0x4f3   :  { %2217 = vmatprep.subr.mxu1 %v1737_v46 }
 0x4f4   :  { %2218 = vmatpush3.msra.mxu1 %v1737_v46 }
 0x4f5   :  { %2219 = vmatprep.subr.mxu1 %v1736_v48 }
 0x4f6   :  { %2220 = vmatpush3.msra.mxu1 %v1736_v48 }
 0x4f7   :  { %2221 = vmatprep.subr.mxu1 %v1735_v50 }
 0x4f8   :  { %2222 = vmatpush3.msra.mxu1 %v1735_v50 }
 0x4f9   :  { %2223 = vmatprep.subr.mxu1 %v1734_v39 }
 0x4fa   :  { %2224 = vmatpush3.msra.mxu1 %v1734_v39 }
 0x4fb   :  { %2225 = vmatprep.subr.mxu1 %v1733_v47 }
 0x4fc   :  { %2226 = vmatpush3.msra.mxu1 %v1733_v47 }
 0x4fd   :  { %2227 = vmatprep.subr.mxu1 %v1732_v10 }
 0x4fe   :  { %2228 = vmatpush3.msra.mxu1 %v1732_v10 }
 0x4ff   :  { %2229 = vmatprep.subr.mxu1 %v1731_v15 }
 0x500   :  { %2230 = vmatpush3.msra.mxu1 %v1731_v15 }
 0x5a1   :  { %v2179_v52 = vpop.f32.mrf.mxu1 }
 0x5a2   :  { %v1594_v53 = vadd.f32 1e-06, %v2179_v52 }
 0x5a3   :  { %v1588_v54 = vpop.f32.mrf.mxu1 }
 0x5a4   :  { %2256 = vrsqrt.f32 %v1594_v53  ;;  %v1589_v55 = vadd.f32 1e-06, %v1588_v54  ;;  %vm1606_vm4 = vcmp.eq.f32.partialorder %v1594_v53, inf  ;;  %v1609_v57 = vand.u32 2147483648, %v1594_v53 }
 0x5a5   :  { %vm1608_vm5 = vcmp.eq.f32.partialorder %v1594_v53, 0.0 }
 0x5a6   :  { %2258 = vrsqrt.f32 %v1589_v55  ;;  %vm1599_vm6 = vcmp.eq.f32.partialorder %v1589_v55, inf  ;;  %v1602_v61 = vand.u32 2147483648, %v1589_v55  ;;  %vm1601_vm7 = vcmp.eq.f32.partialorder %v1589_v55, 0.0 }
 0x5b1   :  { %v2257_v56 = vpop.eup %2256 }
 0x5b2   :  { %v1605_v25 = vmul.f32 %v2257_v56, %v1594_v53 }
 0x5b3   :  { %v2259_v58 = vpop.eup %2258 }
 0x5b4   :  { %v1607_v27 = vsel %vm1606_vm4, %v1594_v53, %v1605_v25  ;;  %v1598_v60 = vmul.f32 %v2259_v58, %v1589_v55 }
 0x5b5   :  { %v1610_v59 = vsel %vm1608_vm5, %v1609_v57, %v1607_v27 }
 0x5b6   :  { %2260 = vrcp.f32 %v1610_v59  ;;  %v1600_v62 = vsel %vm1599_vm6, %v1589_v55, %v1598_v60 }
 0x5b7   :  { %v1603_v63 = vsel %vm1601_vm7, %v1602_v61, %v1600_v62 }
 0x5b8   :  { %2262 = vrcp.f32 %v1603_v63 }
 0x5c3   :  { %v2261_v0 = vpop.eup %2260 }
 0x5c4   :  { %v1614_v1 = vmul.f32 %v2261_v0, %v3058_v21 }
 0x5c5   :  { %v2263_v3 = vpop.eup %2262 }
 0x5c6   :  { %v1612_v20 = vmul.f32 %v2263_v3, %v3060_v44  ;;  %v1623_v5 = vmul.f32 %v1889_v2, %v1614_v1 }
 0x5c8   :  { %v1622_v35 = vmul.f32 %v1889_v2, %v1612_v20  ;;  %v1632_v33 = vadd.f32 %v1890_v6, %v1623_v5 }
 0x5ca   :  { %v1631_v7 = vadd.f32 %v1890_v6, %v1622_v35 }
 0x5cc   :  { %2196 = vmatprep.mubr.msk.f32.mxu0 %vm413_vm1, %v1631_v7 }
 0x5cd   :  { %2197 = vmatmul.mubr.msk.f32.vlgmr.msra.gmra.mxu0 %vm413_vm1, %v1632_v33 }
 0x68d   :  { %v2198_v17 = vpop.f32.mrf.mxu0 }
 0x68e   :  { %v1726_v18 = vadd.f32 %v2198_v17, %v1891_v16 }
 0x68f   :  { %v1720_v19 = vpop.f32.mrf.mxu0 }
 0x690   :  { %v1721_v29 = vadd.f32 %v1891_v16, %v1720_v19  ;;  %v1730_v9 = vmax.f32 %v1726_v18, 0.0 }
 0x692   :  { %v1729_v31 = vmax.f32 %v1721_v29, 0.0 }
 0x694   :  { %2231 = vmatprep.mubr.f32.mxu1 %v1729_v31 }
 0x695   :  { %2232 = vmatmul.mubr.f32.vlgmr.msra.gmra.mxu1 %v1730_v9 }
 0x696   :  { %2275 = shalt.err (!%p2272_p4)
}
 0x697   :  { %s2311_s14 = smov 128   ;;  %s2312_s13 = smov 8   ;;  %v1894_v12 = vld [vmem:[%s3177_s15] ss:$0 sm:$0xff]  ;;  %vm1829_vm8 = vcmask 195584  }
 0x698   :  { %1855 = dma.vmem_to_hbm [thread:$0]  %s1850_s5, 256, %s3179_s17, [#allocation5], %s2311_s14, %s2311_s14, %s2312_s13  }
 0x699   :  { %s2313_s20 = smov [#allocation2]  }
 0x69a   :  { %s1837_s21 = sshll.u32 %s2313_s20, 4  ;;  %s1838_s21 = int_to_ptr.vmem [resolvable:$true] %s1837_s21 }
 0x69b   :  { %s2284_s23 = scalar_lea.vmem %s1838_s21, 256  ;;  %p2289_p6 = scmp.lt.s32.totalorder %s1838_s21, %s1838_s21 }
 0x69c   :  { %p2285_p5 = scmp.ne.s32.totalorder %s1838_s21, %s2284_s23  ;;  %p2290_p7 = scmp.lt.s32.totalorder %s2284_s23, %s2284_s23 }
 0x69e   :  { %p2291_p8 = por %p2290_p7, %p2289_p6 }
 0x6a0   :  { %p2292_p9 = pnand %p2291_p8, %p2285_p5 }
 0x755   :  { %v2233_v37 = vpop.f32.mrf.mxu1 }
 0x756   :  { %v1826_v38 = vadd.f32 %v2233_v37, %v1894_v12 }
 0x757   :  { %v1820_v41 = vpop.f32.mrf.mxu1 }
 0x758   :  { %1831 = vst.msk [vmem:[#allocation2 + $0x8] sm:$0xff] %vm1829_vm8, %v1826_v38  ;;  %v1821_v21 = vadd.f32 %v1894_v12, %v1820_v41 }
 0x75a   :  { %1830 = vst.msk [vmem:[#allocation2] sm:$0xff] %vm1829_vm8, %v1821_v21 }
 0x75b   :  { %2295 = shalt.err (!%p2292_p9)
}
 0x75c   :  { %1843 = dma.vmem_to_hbm [thread:$0]  %s1838_s21, 256, %s3178_s16, [#allocation3], %s2311_s14, %s2311_s14, %s2312_s13  }
 0x75d   :  { %2304 = dma.done.wait [#allocation3], 256  }
 0x75e   :  { %2305 = vsyncadd [#allocation3], 4294967040 }
 0x75f   :  { %2306 = dma.done.wait [#allocation5], 256  }
 0x760   :  { %2307 = vsyncadd [#allocation5], 4294967040 }
 0x761   :  { %1862 = vsyncpa [#allocation3], 1 }
 0x762   :  { %1863 = vsyncpa [#allocation5], 1 }

</bundles_post_ra>
